<compile_context>
chip_gen: v7x
topology: tpu7x:2x2x1
jax: 0.10.0
libtpu: 0.0.40
codegen_flags: <defaults>
</compile_context>

<pallas_src>
import jax
import jax.numpy as jnp
import numpy as np
from jax.experimental import pallas as pl
from jax.experimental.pallas import tpu as pltpu

EPS = 1e-5


def _bn_relu(acc, gamma, beta):
    """Training-mode BatchNorm (batch stats, biased variance) + ReLU in f32.

    Two-pass mean / centered-variance (not E[x^2] - mean^2) for numerical
    robustness on post-ReLU activations."""
    rows = acc.shape[0]
    inv_n = 1.0 / float(rows)
    mean = jnp.sum(acc, axis=0, keepdims=True) * inv_n          # (1, C)
    centered = acc - mean
    var = jnp.sum(centered * centered, axis=0, keepdims=True) * inv_n
    scale = jax.lax.rsqrt(var + EPS) * gamma                     # EUP rsqrt
    return jnp.maximum(centered * scale + beta, 0.0)


def down_block_kernel(x_ref, w1_ref, b1_ref, g1_ref, bt1_ref,
                      w2_ref, b2_ref, g2_ref, bt2_ref,
                      o_ref, xpad_ref):
    """
    x_ref    : (N*Ho, 2, Wo, 2*Cin) f32   input with pooling parities exposed
    w*_ref   : (9, Cin_l, Cout_l)   bf16  dense conv taps, t = ky*3 + kx
    b*_ref   : (1, Cout_l)          f32   conv bias
    g*/bt*   : (1, Cout_l)          f32   BN gamma / beta
    o_ref    : (N, Ho, Wo, Cout)    f32   output (NHWC, real channel width)
    xpad_ref : (N, Ho+2, Wo+2, Cmax) f32  VMEM scratch, halo-padded activation
    """
    N, Ho, Wo, Cout = o_ref.shape
    Cin = x_ref.shape[-1] // 2
    Cmid = w1_ref.shape[-1]
    Cmax = xpad_ref.shape[-1]
    rows = N * Ho * Wo

    # ------------------- fused 2x2 max-pool (VPU only) --------------------
    r0 = x_ref[:, 0, :, :]                                   # (N*Ho, Wo, 2*Cin)
    r1 = x_ref[:, 1, :, :]
    m = jnp.maximum(r0, r1)                                  # reduce H-parity
    pooled = jnp.maximum(m[:, :, :Cin], m[:, :, Cin:])       # reduce W-parity
    pooled = pooled.reshape(N, Ho, Wo, Cin)

    # Zero only the 1-pixel halo border; the interior is fully overwritten per
    # conv, and the zero border is shared by both convolutions.
    xpad_ref[:, 0, :, :] = jnp.zeros((N, Wo + 2, Cmax), jnp.float32)
    xpad_ref[:, Ho + 1, :, :] = jnp.zeros((N, Wo + 2, Cmax), jnp.float32)
    xpad_ref[:, :, 0, :] = jnp.zeros((N, Ho + 2, Cmax), jnp.float32)
    xpad_ref[:, :, Wo + 1, :] = jnp.zeros((N, Ho + 2, Cmax), jnp.float32)

    def conv_bn_relu(act, cin, cout, w_ref, b_ref, g_ref, beta_ref):
        # SAME padding lives entirely in VMEM scratch.
        xpad_ref[:, 1:Ho + 1, 1:Wo + 1, :cin] = act
        # 9 accumulating taps: dense K (no zero lanes), bf16 operands, f32 acc.
        acc = jnp.zeros((rows, cout), jnp.float32)
        for ky in range(3):
            for kx in range(3):
                t = ky * 3 + kx
                patch = xpad_ref[:, ky:ky + Ho, kx:kx + Wo, :cin]
                patch = patch.reshape(rows, cin).astype(jnp.bfloat16)
                acc = acc + jnp.dot(patch, w_ref[t],
                                    preferred_element_type=jnp.float32)
        acc = acc + b_ref[...]                               # conv bias
        return _bn_relu(acc, g_ref[...], beta_ref[...])

    y1 = conv_bn_relu(pooled, Cin, Cmid, w1_ref, b1_ref, g1_ref, bt1_ref)
    y2 = conv_bn_relu(y1.reshape(N, Ho, Wo, Cmid), Cmid, Cout,
                      w2_ref, b2_ref, g2_ref, bt2_ref)

    o_ref[...] = y2.reshape(N, Ho, Wo, Cout)


# ---------------------------------------------------------------------------
# Wrapper (layout glue only; everything of substance stays in the kernel)
# ---------------------------------------------------------------------------
@jax.jit
def down_block(x_nchw, params):
    N, Cin, H, W = x_nchw.shape
    assert H % 2 == 0 and W % 2 == 0
    Ho, Wo = H // 2, W // 2
    Cmid = params["w1"].shape[-1]
    Cout = params["w2"].shape[-1]
    Cmax = max(Cin, Cmid)

    # NCHW -> NHWC, then a FREE contiguous reshape exposing the 2x2 pooling
    # phases (no 128-lane channel padding in HBM).
    x = jnp.transpose(x_nchw, (0, 2, 3, 1)).reshape(N * Ho, 2, Wo, 2 * Cin)

    # Dense conv weights (HWIO -> (tap, cin, cout)), shipped bf16 for the MXU.
    w1 = params["w1"].reshape(9, Cin, Cmid).astype(jnp.bfloat16)
    w2 = params["w2"].reshape(9, Cmid, Cout).astype(jnp.bfloat16)

    def row(v):
        return v.reshape(1, -1).astype(jnp.float32)

    b1, g1, bt1 = row(params["b1"]), row(params["g1"]), row(params["beta1"])
    b2, g2, bt2 = row(params["b2"]), row(params["g2"]), row(params["beta2"])

    vspec = pl.BlockSpec(memory_space=pltpu.MemorySpace.VMEM)
    out = pl.pallas_call(
        down_block_kernel,
        out_shape=jax.ShapeDtypeStruct((N, Ho, Wo, Cout), jnp.float32),
        in_specs=[vspec] * 9,
        out_specs=vspec,
        scratch_shapes=[
            pltpu.VMEM((N, Ho + 2, Wo + 2, Cmax), jnp.float32),  # halo scratch
        ],
    )(x, w1, b1, g1, bt1, w2, b2, g2, bt2)

    return jnp.transpose(out, (0, 3, 1, 2))    # NHWC -> NCHW (module contract)


# ---------------------------------------------------------------------------
# Pure-JAX reference (accurate f32; includes conv bias, batch-stats BN)
# ---------------------------------------------------------------------------
def ref_down_block(x_nchw, params):
    x = jnp.transpose(x_nchw, (0, 2, 3, 1))
    N, H, W, C = x.shape
    x = x.reshape(N, H // 2, 2, W // 2, 2, C).max(axis=(2, 4))

    def cbr(x, w, b, g, bt):
        y = jax.lax.conv_general_dilated(
            x, w, (1, 1), "SAME",
            dimension_numbers=("NHWC", "HWIO", "NHWC"),
            precision=jax.lax.Precision.HIGHEST)
        y = y + b
        mean = y.mean(axis=(0, 1, 2), keepdims=True)
        var = ((y - mean) ** 2).mean(axis=(0, 1, 2), keepdims=True)
        y = (y - mean) * jax.lax.rsqrt(var + EPS)
        return jnp.maximum(y * g + bt, 0.0)

    x = cbr(x, params["w1"], params["b1"], params["g1"], params["beta1"])
    x = cbr(x, params["w2"], params["b2"], params["g2"], params["beta2"])
    return jnp.transpose(x, (0, 3, 1, 2))


# ---------------------------------------------------------------------------
if __name__ == "__main__":
    key = jax.random.PRNGKey(0)
    N, Cin, Cout, H, W = 2, 4, 8, 16, 16            # DownBlock(4, 8)
    Cmid = Cout

    k = jax.random.split(key, 9)
    x = jax.random.normal(k[0], (N, Cin, H, W), jnp.float32)

    # Deterministic synthetic parameters (conv weights in HWIO layout).
    params = {
        "w1": jax.random.normal(k[1], (3, 3, Cin, Cmid), jnp.float32) * 0.2,
        "b1": jax.random.normal(k[2], (Cmid,), jnp.float32) * 0.1,
        "g1": 1.0 + 0.1 * jax.random.normal(k[3], (Cmid,), jnp.float32),
        "beta1": 0.1 * jax.random.normal(k[4], (Cmid,), jnp.float32),
        "w2": jax.random.normal(k[5], (3, 3, Cmid, Cout), jnp.float32) * 0.2,
        "b2": jax.random.normal(k[6], (Cout,), jnp.float32) * 0.1,
        "g2": 1.0 + 0.1 * jax.random.normal(k[7], (Cout,), jnp.float32),
        "beta2": 0.1 * jax.random.normal(k[8], (Cout,), jnp.float32),
    }

    out = jax.block_until_ready(down_block(x, params))
    ref = jax.block_until_ready(ref_down_block(x, params))

    assert out.shape == (N, Cout, H // 2, W // 2), out.shape
    # bf16 MXU operands (f32 accumulate) vs. an f32 HIGHEST-precision reference:
    # expected element error is ~1e-2 on unit-variance post-BN activations.
    np.testing.assert_allclose(np.asarray(out), np.asarray(ref),
                               rtol=5e-2, atol=5e-2)
    print("KERNEL_OK")
</pallas_src>

<mosaic_0001>
module attributes {stable_mosaic.version = 11 : i64} {
  func.func @down_block_kernel(%arg0: memref<16x2x8x8xf32, #tpu.memory_space<vmem>>, %arg1: memref<9x4x8xbf16, #tpu.memory_space<vmem>>, %arg2: memref<1x8xf32, #tpu.memory_space<vmem>>, %arg3: memref<1x8xf32, #tpu.memory_space<vmem>>, %arg4: memref<1x8xf32, #tpu.memory_space<vmem>>, %arg5: memref<9x8x8xbf16, #tpu.memory_space<vmem>>, %arg6: memref<1x8xf32, #tpu.memory_space<vmem>>, %arg7: memref<1x8xf32, #tpu.memory_space<vmem>>, %arg8: memref<1x8xf32, #tpu.memory_space<vmem>>, %arg9: memref<2x8x8x8xf32, #tpu.memory_space<vmem>>, %arg10: memref<2x10x10x8xf32, #tpu.memory_space<vmem>>) attributes {dimension_semantics = [], scalar_prefetch = 0 : i64, scratch_operands = 1 : i64, tpu.core_type = #tpu.core_type<tc>} {
    %c0 = arith.constant 0 : index
    %c0_0 = arith.constant 0 : index
    %c0_1 = arith.constant 0 : index
    %c0_2 = arith.constant 0 : index
    %0 = vector.load %arg0[%c0, %c0_0, %c0_1, %c0_2] : memref<16x2x8x8xf32, #tpu.memory_space<vmem>>, vector<16x1x8x8xf32>
    %1 = vector.shape_cast %0 : vector<16x1x8x8xf32> to vector<16x8x8xf32>
    %c0_3 = arith.constant 0 : index
    %c1 = arith.constant 1 : index
    %c0_4 = arith.constant 0 : index
    %c0_5 = arith.constant 0 : index
    %2 = vector.load %arg0[%c0_3, %c1, %c0_4, %c0_5] : memref<16x2x8x8xf32, #tpu.memory_space<vmem>>, vector<16x1x8x8xf32>
    %3 = vector.shape_cast %2 : vector<16x1x8x8xf32> to vector<16x8x8xf32>
    %4 = arith.maximumf %1, %3 : vector<16x8x8xf32>
    %5 = vector.extract_strided_slice %4 {offsets = [0, 0, 0], sizes = [16, 8, 4], strides = [1, 1, 1]} : vector<16x8x8xf32> to vector<16x8x4xf32>
    %6 = vector.extract_strided_slice %4 {offsets = [0, 0, 4], sizes = [16, 8, 4], strides = [1, 1, 1]} : vector<16x8x8xf32> to vector<16x8x4xf32>
    %7 = arith.maximumf %5, %6 : vector<16x8x4xf32>
    %8 = vector.shape_cast %7 : vector<16x8x4xf32> to vector<2x8x8x4xf32>
    %cst = arith.constant 0.000000e+00 : f32
    %9 = vector.broadcast %cst : f32 to vector<2x10x8xf32>
    %c0_6 = arith.constant 0 : index
    %c0_7 = arith.constant 0 : index
    %c0_8 = arith.constant 0 : index
    %c0_9 = arith.constant 0 : index
    %10 = vector.load %arg10[%c0_6, %c0_7, %c0_8, %c0_9] : memref<2x10x10x8xf32, #tpu.memory_space<vmem>>, vector<2x1x10x8xf32>
    %11 = vector.shape_cast %10 : vector<2x1x10x8xf32> to vector<2x10x8xf32>
    %12 = vector.shape_cast %9 : vector<2x10x8xf32> to vector<2x1x10x8xf32>
    tpu.vector_store %arg10[%c0_6, %c0_7, %c0_8, %c0_9], %12 {strides = array<i32>} : memref<2x10x10x8xf32, #tpu.memory_space<vmem>>, vector<2x1x10x8xf32>,
    %cst_10 = arith.constant 0.000000e+00 : f32
    %13 = vector.broadcast %cst_10 : f32 to vector<2x10x8xf32>
    %c0_11 = arith.constant 0 : index
    %c9 = arith.constant 9 : index
    %c0_12 = arith.constant 0 : index
    %c0_13 = arith.constant 0 : index
    %14 = vector.load %arg10[%c0_11, %c9, %c0_12, %c0_13] : memref<2x10x10x8xf32, #tpu.memory_space<vmem>>, vector<2x1x10x8xf32>
    %15 = vector.shape_cast %14 : vector<2x1x10x8xf32> to vector<2x10x8xf32>
    %16 = vector.shape_cast %13 : vector<2x10x8xf32> to vector<2x1x10x8xf32>
    tpu.vector_store %arg10[%c0_11, %c9, %c0_12, %c0_13], %16 {strides = array<i32>} : memref<2x10x10x8xf32, #tpu.memory_space<vmem>>, vector<2x1x10x8xf32>,
    %cst_14 = arith.constant 0.000000e+00 : f32
    %17 = vector.broadcast %cst_14 : f32 to vector<2x10x8xf32>
    %c0_15 = arith.constant 0 : index
    %c0_16 = arith.constant 0 : index
    %c0_17 = arith.constant 0 : index
    %c0_18 = arith.constant 0 : index
    %18 = vector.load %arg10[%c0_15, %c0_16, %c0_17, %c0_18] : memref<2x10x10x8xf32, #tpu.memory_space<vmem>>, vector<2x10x1x8xf32>
    %19 = vector.shape_cast %18 : vector<2x10x1x8xf32> to vector<2x10x8xf32>
    %20 = vector.shape_cast %17 : vector<2x10x8xf32> to vector<2x10x1x8xf32>
    tpu.vector_store %arg10[%c0_15, %c0_16, %c0_17, %c0_18], %20 {strides = array<i32>} : memref<2x10x10x8xf32, #tpu.memory_space<vmem>>, vector<2x10x1x8xf32>,
    %cst_19 = arith.constant 0.000000e+00 : f32
    %21 = vector.broadcast %cst_19 : f32 to vector<2x10x8xf32>
    %c0_20 = arith.constant 0 : index
    %c0_21 = arith.constant 0 : index
    %c9_22 = arith.constant 9 : index
    %c0_23 = arith.constant 0 : index
    %22 = vector.load %arg10[%c0_20, %c0_21, %c9_22, %c0_23] : memref<2x10x10x8xf32, #tpu.memory_space<vmem>>, vector<2x10x1x8xf32>
    %23 = vector.shape_cast %22 : vector<2x10x1x8xf32> to vector<2x10x8xf32>
    %24 = vector.shape_cast %21 : vector<2x10x8xf32> to vector<2x10x1x8xf32>
    tpu.vector_store %arg10[%c0_20, %c0_21, %c9_22, %c0_23], %24 {strides = array<i32>} : memref<2x10x10x8xf32, #tpu.memory_space<vmem>>, vector<2x10x1x8xf32>,
    %c0_24 = arith.constant 0 : index
    %c1_25 = arith.constant 1 : index
    %c1_26 = arith.constant 1 : index
    %c0_27 = arith.constant 0 : index
    %25 = vector.load %arg10[%c0_24, %c1_25, %c1_26, %c0_27] : memref<2x10x10x8xf32, #tpu.memory_space<vmem>>, vector<2x8x8x4xf32>
    tpu.vector_store %arg10[%c0_24, %c1_25, %c1_26, %c0_27], %8 {strides = array<i32>} : memref<2x10x10x8xf32, #tpu.memory_space<vmem>>, vector<2x8x8x4xf32>,
    %cst_28 = arith.constant 0.000000e+00 : f32
    %26 = vector.broadcast %cst_28 : f32 to vector<128x8xf32>
    %c0_29 = arith.constant 0 : index
    %c0_30 = arith.constant 0 : index
    %c0_31 = arith.constant 0 : index
    %c0_32 = arith.constant 0 : index
    %27 = vector.load %arg10[%c0_29, %c0_30, %c0_31, %c0_32] : memref<2x10x10x8xf32, #tpu.memory_space<vmem>>, vector<2x8x8x4xf32>
    %28 = vector.shape_cast %27 : vector<2x8x8x4xf32> to vector<128x4xf32>
    %29 = arith.truncf %28 : vector<128x4xf32> to vector<128x4xbf16>
    %c0_33 = arith.constant 0 : index
    %c0_34 = arith.constant 0 : index
    %c0_35 = arith.constant 0 : index
    %30 = vector.load %arg1[%c0_33, %c0_34, %c0_35] : memref<9x4x8xbf16, #tpu.memory_space<vmem>>, vector<1x4x8xbf16>
    %31 = vector.shape_cast %30 : vector<1x4x8xbf16> to vector<4x8xbf16>
    %cst_36 = arith.constant dense<0.000000e+00> : vector<128x8xf32>
    %32 = tpu.matmul %29, %31, %cst_36 {dimension_numbers = #tpu.dot_dimension_numbers<[1], [0], [0], [1], [0, 0, 1, 1], [], []>} : vector<128x4xbf16>, vector<4x8xbf16>, vector<128x8xf32> -> vector<128x8xf32>
    %33 = arith.addf %26, %32 : vector<128x8xf32>
    %c0_37 = arith.constant 0 : index
    %c0_38 = arith.constant 0 : index
    %c1_39 = arith.constant 1 : index
    %c0_40 = arith.constant 0 : index
    %34 = vector.load %arg10[%c0_37, %c0_38, %c1_39, %c0_40] : memref<2x10x10x8xf32, #tpu.memory_space<vmem>>, vector<2x8x8x4xf32>
    %35 = vector.shape_cast %34 : vector<2x8x8x4xf32> to vector<128x4xf32>
    %36 = arith.truncf %35 : vector<128x4xf32> to vector<128x4xbf16>
    %c1_41 = arith.constant 1 : index
    %c0_42 = arith.constant 0 : index
    %c0_43 = arith.constant 0 : index
    %37 = vector.load %arg1[%c1_41, %c0_42, %c0_43] : memref<9x4x8xbf16, #tpu.memory_space<vmem>>, vector<1x4x8xbf16>
    %38 = vector.shape_cast %37 : vector<1x4x8xbf16> to vector<4x8xbf16>
    %cst_44 = arith.constant dense<0.000000e+00> : vector<128x8xf32>
    %39 = tpu.matmul %36, %38, %cst_44 {dimension_numbers = #tpu.dot_dimension_numbers<[1], [0], [0], [1], [0, 0, 1, 1], [], []>} : vector<128x4xbf16>, vector<4x8xbf16>, vector<128x8xf32> -> vector<128x8xf32>
    %40 = arith.addf %33, %39 : vector<128x8xf32>
    %c0_45 = arith.constant 0 : index
    %c0_46 = arith.constant 0 : index
    %c2 = arith.constant 2 : index
    %c0_47 = arith.constant 0 : index
    %41 = vector.load %arg10[%c0_45, %c0_46, %c2, %c0_47] : memref<2x10x10x8xf32, #tpu.memory_space<vmem>>, vector<2x8x8x4xf32>
    %42 = vector.shape_cast %41 : vector<2x8x8x4xf32> to vector<128x4xf32>
    %43 = arith.truncf %42 : vector<128x4xf32> to vector<128x4xbf16>
    %c2_48 = arith.constant 2 : index
    %c0_49 = arith.constant 0 : index
    %c0_50 = arith.constant 0 : index
    %44 = vector.load %arg1[%c2_48, %c0_49, %c0_50] : memref<9x4x8xbf16, #tpu.memory_space<vmem>>, vector<1x4x8xbf16>
    %45 = vector.shape_cast %44 : vector<1x4x8xbf16> to vector<4x8xbf16>
    %cst_51 = arith.constant dense<0.000000e+00> : vector<128x8xf32>
    %46 = tpu.matmul %43, %45, %cst_51 {dimension_numbers = #tpu.dot_dimension_numbers<[1], [0], [0], [1], [0, 0, 1, 1], [], []>} : vector<128x4xbf16>, vector<4x8xbf16>, vector<128x8xf32> -> vector<128x8xf32>
    %47 = arith.addf %40, %46 : vector<128x8xf32>
    %c0_52 = arith.constant 0 : index
    %c1_53 = arith.constant 1 : index
    %c0_54 = arith.constant 0 : index
    %c0_55 = arith.constant 0 : index
    %48 = vector.load %arg10[%c0_52, %c1_53, %c0_54, %c0_55] : memref<2x10x10x8xf32, #tpu.memory_space<vmem>>, vector<2x8x8x4xf32>
    %49 = vector.shape_cast %48 : vector<2x8x8x4xf32> to vector<128x4xf32>
    %50 = arith.truncf %49 : vector<128x4xf32> to vector<128x4xbf16>
    %c3 = arith.constant 3 : index
    %c0_56 = arith.constant 0 : index
    %c0_57 = arith.constant 0 : index
    %51 = vector.load %arg1[%c3, %c0_56, %c0_57] : memref<9x4x8xbf16, #tpu.memory_space<vmem>>, vector<1x4x8xbf16>
    %52 = vector.shape_cast %51 : vector<1x4x8xbf16> to vector<4x8xbf16>
    %cst_58 = arith.constant dense<0.000000e+00> : vector<128x8xf32>
    %53 = tpu.matmul %50, %52, %cst_58 {dimension_numbers = #tpu.dot_dimension_numbers<[1], [0], [0], [1], [0, 0, 1, 1], [], []>} : vector<128x4xbf16>, vector<4x8xbf16>, vector<128x8xf32> -> vector<128x8xf32>
    %54 = arith.addf %47, %53 : vector<128x8xf32>
    %c0_59 = arith.constant 0 : index
    %c1_60 = arith.constant 1 : index
    %c1_61 = arith.constant 1 : index
    %c0_62 = arith.constant 0 : index
    %55 = vector.load %arg10[%c0_59, %c1_60, %c1_61, %c0_62] : memref<2x10x10x8xf32, #tpu.memory_space<vmem>>, vector<2x8x8x4xf32>
    %56 = vector.shape_cast %55 : vector<2x8x8x4xf32> to vector<128x4xf32>
    %57 = arith.truncf %56 : vector<128x4xf32> to vector<128x4xbf16>
    %c4 = arith.constant 4 : index
    %c0_63 = arith.constant 0 : index
    %c0_64 = arith.constant 0 : index
    %58 = vector.load %arg1[%c4, %c0_63, %c0_64] : memref<9x4x8xbf16, #tpu.memory_space<vmem>>, vector<1x4x8xbf16>
    %59 = vector.shape_cast %58 : vector<1x4x8xbf16> to vector<4x8xbf16>
    %cst_65 = arith.constant dense<0.000000e+00> : vector<128x8xf32>
    %60 = tpu.matmul %57, %59, %cst_65 {dimension_numbers = #tpu.dot_dimension_numbers<[1], [0], [0], [1], [0, 0, 1, 1], [], []>} : vector<128x4xbf16>, vector<4x8xbf16>, vector<128x8xf32> -> vector<128x8xf32>
    %61 = arith.addf %54, %60 : vector<128x8xf32>
    %c0_66 = arith.constant 0 : index
    %c1_67 = arith.constant 1 : index
    %c2_68 = arith.constant 2 : index
    %c0_69 = arith.constant 0 : index
    %62 = vector.load %arg10[%c0_66, %c1_67, %c2_68, %c0_69] : memref<2x10x10x8xf32, #tpu.memory_space<vmem>>, vector<2x8x8x4xf32>
    %63 = vector.shape_cast %62 : vector<2x8x8x4xf32> to vector<128x4xf32>
    %64 = arith.truncf %63 : vector<128x4xf32> to vector<128x4xbf16>
    %c5 = arith.constant 5 : index
    %c0_70 = arith.constant 0 : index
    %c0_71 = arith.constant 0 : index
    %65 = vector.load %arg1[%c5, %c0_70, %c0_71] : memref<9x4x8xbf16, #tpu.memory_space<vmem>>, vector<1x4x8xbf16>
    %66 = vector.shape_cast %65 : vector<1x4x8xbf16> to vector<4x8xbf16>
    %cst_72 = arith.constant dense<0.000000e+00> : vector<128x8xf32>
    %67 = tpu.matmul %64, %66, %cst_72 {dimension_numbers = #tpu.dot_dimension_numbers<[1], [0], [0], [1], [0, 0, 1, 1], [], []>} : vector<128x4xbf16>, vector<4x8xbf16>, vector<128x8xf32> -> vector<128x8xf32>
    %68 = arith.addf %61, %67 : vector<128x8xf32>
    %c0_73 = arith.constant 0 : index
    %c2_74 = arith.constant 2 : index
    %c0_75 = arith.constant 0 : index
    %c0_76 = arith.constant 0 : index
    %69 = vector.load %arg10[%c0_73, %c2_74, %c0_75, %c0_76] : memref<2x10x10x8xf32, #tpu.memory_space<vmem>>, vector<2x8x8x4xf32>
    %70 = vector.shape_cast %69 : vector<2x8x8x4xf32> to vector<128x4xf32>
    %71 = arith.truncf %70 : vector<128x4xf32> to vector<128x4xbf16>
    %c6 = arith.constant 6 : index
    %c0_77 = arith.constant 0 : index
    %c0_78 = arith.constant 0 : index
    %72 = vector.load %arg1[%c6, %c0_77, %c0_78] : memref<9x4x8xbf16, #tpu.memory_space<vmem>>, vector<1x4x8xbf16>
    %73 = vector.shape_cast %72 : vector<1x4x8xbf16> to vector<4x8xbf16>
    %cst_79 = arith.constant dense<0.000000e+00> : vector<128x8xf32>
    %74 = tpu.matmul %71, %73, %cst_79 {dimension_numbers = #tpu.dot_dimension_numbers<[1], [0], [0], [1], [0, 0, 1, 1], [], []>} : vector<128x4xbf16>, vector<4x8xbf16>, vector<128x8xf32> -> vector<128x8xf32>
    %75 = arith.addf %68, %74 : vector<128x8xf32>
    %c0_80 = arith.constant 0 : index
    %c2_81 = arith.constant 2 : index
    %c1_82 = arith.constant 1 : index
    %c0_83 = arith.constant 0 : index
    %76 = vector.load %arg10[%c0_80, %c2_81, %c1_82, %c0_83] : memref<2x10x10x8xf32, #tpu.memory_space<vmem>>, vector<2x8x8x4xf32>
    %77 = vector.shape_cast %76 : vector<2x8x8x4xf32> to vector<128x4xf32>
    %78 = arith.truncf %77 : vector<128x4xf32> to vector<128x4xbf16>
    %c7 = arith.constant 7 : index
    %c0_84 = arith.constant 0 : index
    %c0_85 = arith.constant 0 : index
    %79 = vector.load %arg1[%c7, %c0_84, %c0_85] : memref<9x4x8xbf16, #tpu.memory_space<vmem>>, vector<1x4x8xbf16>
    %80 = vector.shape_cast %79 : vector<1x4x8xbf16> to vector<4x8xbf16>
    %cst_86 = arith.constant dense<0.000000e+00> : vector<128x8xf32>
    %81 = tpu.matmul %78, %80, %cst_86 {dimension_numbers = #tpu.dot_dimension_numbers<[1], [0], [0], [1], [0, 0, 1, 1], [], []>} : vector<128x4xbf16>, vector<4x8xbf16>, vector<128x8xf32> -> vector<128x8xf32>
    %82 = arith.addf %75, %81 : vector<128x8xf32>
    %c0_87 = arith.constant 0 : index
    %c2_88 = arith.constant 2 : index
    %c2_89 = arith.constant 2 : index
    %c0_90 = arith.constant 0 : index
    %83 = vector.load %arg10[%c0_87, %c2_88, %c2_89, %c0_90] : memref<2x10x10x8xf32, #tpu.memory_space<vmem>>, vector<2x8x8x4xf32>
    %84 = vector.shape_cast %83 : vector<2x8x8x4xf32> to vector<128x4xf32>
    %85 = arith.truncf %84 : vector<128x4xf32> to vector<128x4xbf16>
    %c8 = arith.constant 8 : index
    %c0_91 = arith.constant 0 : index
    %c0_92 = arith.constant 0 : index
    %86 = vector.load %arg1[%c8, %c0_91, %c0_92] : memref<9x4x8xbf16, #tpu.memory_space<vmem>>, vector<1x4x8xbf16>
    %87 = vector.shape_cast %86 : vector<1x4x8xbf16> to vector<4x8xbf16>
    %cst_93 = arith.constant dense<0.000000e+00> : vector<128x8xf32>
    %88 = tpu.matmul %85, %87, %cst_93 {dimension_numbers = #tpu.dot_dimension_numbers<[1], [0], [0], [1], [0, 0, 1, 1], [], []>} : vector<128x4xbf16>, vector<4x8xbf16>, vector<128x8xf32> -> vector<128x8xf32>
    %89 = arith.addf %82, %88 : vector<128x8xf32>
    %c0_94 = arith.constant 0 : index
    %c0_95 = arith.constant 0 : index
    %90 = vector.load %arg2[%c0_94, %c0_95] : memref<1x8xf32, #tpu.memory_space<vmem>>, vector<1x8xf32>
    %91 = vector.broadcast %90 : vector<1x8xf32> to vector<128x8xf32>
    %92 = arith.addf %89, %91 : vector<128x8xf32>
    %c0_96 = arith.constant 0 : index
    %c0_97 = arith.constant 0 : index
    %93 = vector.load %arg3[%c0_96, %c0_97] : memref<1x8xf32, #tpu.memory_space<vmem>>, vector<1x8xf32>
    %c0_98 = arith.constant 0 : index
    %c0_99 = arith.constant 0 : index
    %94 = vector.load %arg4[%c0_98, %c0_99] : memref<1x8xf32, #tpu.memory_space<vmem>>, vector<1x8xf32>
    %cst_100 = arith.constant dense<0.000000e+00> : vector<8xf32>
    %95 = vector.multi_reduction <add>, %92, %cst_100 [0] : vector<128x8xf32> to vector<8xf32>
    %96 = vector.shape_cast %95 : vector<8xf32> to vector<1x8xf32>
    %cst_101 = arith.constant 7.812500e-03 : f32
    %97 = vector.broadcast %cst_101 : f32 to vector<1x8xf32>
    %98 = arith.mulf %96, %97 : vector<1x8xf32>
    %99 = vector.broadcast %98 : vector<1x8xf32> to vector<128x8xf32>
    %100 = arith.subf %92, %99 : vector<128x8xf32>
    %101 = arith.mulf %100, %100 : vector<128x8xf32>
    %cst_102 = arith.constant dense<0.000000e+00> : vector<8xf32>
    %102 = vector.multi_reduction <add>, %101, %cst_102 [0] : vector<128x8xf32> to vector<8xf32>
    %103 = vector.shape_cast %102 : vector<8xf32> to vector<1x8xf32>
    %cst_103 = arith.constant 7.812500e-03 : f32
    %104 = vector.broadcast %cst_103 : f32 to vector<1x8xf32>
    %105 = arith.mulf %103, %104 : vector<1x8xf32>
    %cst_104 = arith.constant 9.99999974E-6 : f32
    %106 = vector.broadcast %cst_104 : f32 to vector<1x8xf32>
    %107 = arith.addf %105, %106 : vector<1x8xf32>
    %108 = math.rsqrt %107 : vector<1x8xf32>
    %109 = arith.mulf %108, %93 : vector<1x8xf32>
    %110 = vector.broadcast %109 : vector<1x8xf32> to vector<128x8xf32>
    %111 = arith.mulf %100, %110 : vector<128x8xf32>
    %112 = vector.broadcast %94 : vector<1x8xf32> to vector<128x8xf32>
    %113 = arith.addf %111, %112 : vector<128x8xf32>
    %cst_105 = arith.constant 0.000000e+00 : f32
    %114 = vector.broadcast %cst_105 : f32 to vector<128x8xf32>
    %115 = arith.maximumf %113, %114 : vector<128x8xf32>
    %116 = vector.shape_cast %115 : vector<128x8xf32> to vector<2x8x8x8xf32>
    %c0_106 = arith.constant 0 : index
    %c1_107 = arith.constant 1 : index
    %c1_108 = arith.constant 1 : index
    %c0_109 = arith.constant 0 : index
    %117 = vector.load %arg10[%c0_106, %c1_107, %c1_108, %c0_109] : memref<2x10x10x8xf32, #tpu.memory_space<vmem>>, vector<2x8x8x8xf32>
    tpu.vector_store %arg10[%c0_106, %c1_107, %c1_108, %c0_109], %116 {strides = array<i32>} : memref<2x10x10x8xf32, #tpu.memory_space<vmem>>, vector<2x8x8x8xf32>,
    %cst_110 = arith.constant 0.000000e+00 : f32
    %118 = vector.broadcast %cst_110 : f32 to vector<128x8xf32>
    %c0_111 = arith.constant 0 : index
    %c0_112 = arith.constant 0 : index
    %c0_113 = arith.constant 0 : index
    %c0_114 = arith.constant 0 : index
    %119 = vector.load %arg10[%c0_111, %c0_112, %c0_113, %c0_114] : memref<2x10x10x8xf32, #tpu.memory_space<vmem>>, vector<2x8x8x8xf32>
    %120 = vector.shape_cast %119 : vector<2x8x8x8xf32> to vector<128x8xf32>
    %121 = arith.truncf %120 : vector<128x8xf32> to vector<128x8xbf16>
    %c0_115 = arith.constant 0 : index
    %c0_116 = arith.constant 0 : index
    %c0_117 = arith.constant 0 : index
    %122 = vector.load %arg5[%c0_115, %c0_116, %c0_117] : memref<9x8x8xbf16, #tpu.memory_space<vmem>>, vector<1x8x8xbf16>
    %123 = vector.shape_cast %122 : vector<1x8x8xbf16> to vector<8x8xbf16>
    %cst_118 = arith.constant dense<0.000000e+00> : vector<128x8xf32>
    %124 = tpu.matmul %121, %123, %cst_118 {dimension_numbers = #tpu.dot_dimension_numbers<[1], [0], [0], [1], [0, 0, 1, 1], [], []>} : vector<128x8xbf16>, vector<8x8xbf16>, vector<128x8xf32> -> vector<128x8xf32>
    %125 = arith.addf %118, %124 : vector<128x8xf32>
    %c0_119 = arith.constant 0 : index
    %c0_120 = arith.constant 0 : index
    %c1_121 = arith.constant 1 : index
    %c0_122 = arith.constant 0 : index
    %126 = vector.load %arg10[%c0_119, %c0_120, %c1_121, %c0_122] : memref<2x10x10x8xf32, #tpu.memory_space<vmem>>, vector<2x8x8x8xf32>
    %127 = vector.shape_cast %126 : vector<2x8x8x8xf32> to vector<128x8xf32>
    %128 = arith.truncf %127 : vector<128x8xf32> to vector<128x8xbf16>
    %c1_123 = arith.constant 1 : index
    %c0_124 = arith.constant 0 : index
    %c0_125 = arith.constant 0 : index
    %129 = vector.load %arg5[%c1_123, %c0_124, %c0_125] : memref<9x8x8xbf16, #tpu.memory_space<vmem>>, vector<1x8x8xbf16>
    %130 = vector.shape_cast %129 : vector<1x8x8xbf16> to vector<8x8xbf16>
    %cst_126 = arith.constant dense<0.000000e+00> : vector<128x8xf32>
    %131 = tpu.matmul %128, %130, %cst_126 {dimension_numbers = #tpu.dot_dimension_numbers<[1], [0], [0], [1], [0, 0, 1, 1], [], []>} : vector<128x8xbf16>, vector<8x8xbf16>, vector<128x8xf32> -> vector<128x8xf32>
    %132 = arith.addf %125, %131 : vector<128x8xf32>
    %c0_127 = arith.constant 0 : index
    %c0_128 = arith.constant 0 : index
    %c2_129 = arith.constant 2 : index
    %c0_130 = arith.constant 0 : index
    %133 = vector.load %arg10[%c0_127, %c0_128, %c2_129, %c0_130] : memref<2x10x10x8xf32, #tpu.memory_space<vmem>>, vector<2x8x8x8xf32>
    %134 = vector.shape_cast %133 : vector<2x8x8x8xf32> to vector<128x8xf32>
    %135 = arith.truncf %134 : vector<128x8xf32> to vector<128x8xbf16>
    %c2_131 = arith.constant 2 : index
    %c0_132 = arith.constant 0 : index
    %c0_133 = arith.constant 0 : index
    %136 = vector.load %arg5[%c2_131, %c0_132, %c0_133] : memref<9x8x8xbf16, #tpu.memory_space<vmem>>, vector<1x8x8xbf16>
    %137 = vector.shape_cast %136 : vector<1x8x8xbf16> to vector<8x8xbf16>
    %cst_134 = arith.constant dense<0.000000e+00> : vector<128x8xf32>
    %138 = tpu.matmul %135, %137, %cst_134 {dimension_numbers = #tpu.dot_dimension_numbers<[1], [0], [0], [1], [0, 0, 1, 1], [], []>} : vector<128x8xbf16>, vector<8x8xbf16>, vector<128x8xf32> -> vector<128x8xf32>
    %139 = arith.addf %132, %138 : vector<128x8xf32>
    %c0_135 = arith.constant 0 : index
    %c1_136 = arith.constant 1 : index
    %c0_137 = arith.constant 0 : index
    %c0_138 = arith.constant 0 : index
    %140 = vector.load %arg10[%c0_135, %c1_136, %c0_137, %c0_138] : memref<2x10x10x8xf32, #tpu.memory_space<vmem>>, vector<2x8x8x8xf32>
    %141 = vector.shape_cast %140 : vector<2x8x8x8xf32> to vector<128x8xf32>
    %142 = arith.truncf %141 : vector<128x8xf32> to vector<128x8xbf16>
    %c3_139 = arith.constant 3 : index
    %c0_140 = arith.constant 0 : index
    %c0_141 = arith.constant 0 : index
    %143 = vector.load %arg5[%c3_139, %c0_140, %c0_141] : memref<9x8x8xbf16, #tpu.memory_space<vmem>>, vector<1x8x8xbf16>
    %144 = vector.shape_cast %143 : vector<1x8x8xbf16> to vector<8x8xbf16>
    %cst_142 = arith.constant dense<0.000000e+00> : vector<128x8xf32>
    %145 = tpu.matmul %142, %144, %cst_142 {dimension_numbers = #tpu.dot_dimension_numbers<[1], [0], [0], [1], [0, 0, 1, 1], [], []>} : vector<128x8xbf16>, vector<8x8xbf16>, vector<128x8xf32> -> vector<128x8xf32>
    %146 = arith.addf %139, %145 : vector<128x8xf32>
    %c0_143 = arith.constant 0 : index
    %c1_144 = arith.constant 1 : index
    %c1_145 = arith.constant 1 : index
    %c0_146 = arith.constant 0 : index
    %147 = vector.load %arg10[%c0_143, %c1_144, %c1_145, %c0_146] : memref<2x10x10x8xf32, #tpu.memory_space<vmem>>, vector<2x8x8x8xf32>
    %148 = vector.shape_cast %147 : vector<2x8x8x8xf32> to vector<128x8xf32>
    %149 = arith.truncf %148 : vector<128x8xf32> to vector<128x8xbf16>
    %c4_147 = arith.constant 4 : index
    %c0_148 = arith.constant 0 : index
    %c0_149 = arith.constant 0 : index
    %150 = vector.load %arg5[%c4_147, %c0_148, %c0_149] : memref<9x8x8xbf16, #tpu.memory_space<vmem>>, vector<1x8x8xbf16>
    %151 = vector.shape_cast %150 : vector<1x8x8xbf16> to vector<8x8xbf16>
    %cst_150 = arith.constant dense<0.000000e+00> : vector<128x8xf32>
    %152 = tpu.matmul %149, %151, %cst_150 {dimension_numbers = #tpu.dot_dimension_numbers<[1], [0], [0], [1], [0, 0, 1, 1], [], []>} : vector<128x8xbf16>, vector<8x8xbf16>, vector<128x8xf32> -> vector<128x8xf32>
    %153 = arith.addf %146, %152 : vector<128x8xf32>
    %c0_151 = arith.constant 0 : index
    %c1_152 = arith.constant 1 : index
    %c2_153 = arith.constant 2 : index
    %c0_154 = arith.constant 0 : index
    %154 = vector.load %arg10[%c0_151, %c1_152, %c2_153, %c0_154] : memref<2x10x10x8xf32, #tpu.memory_space<vmem>>, vector<2x8x8x8xf32>
    %155 = vector.shape_cast %154 : vector<2x8x8x8xf32> to vector<128x8xf32>
    %156 = arith.truncf %155 : vector<128x8xf32> to vector<128x8xbf16>
    %c5_155 = arith.constant 5 : index
    %c0_156 = arith.constant 0 : index
    %c0_157 = arith.constant 0 : index
    %157 = vector.load %arg5[%c5_155, %c0_156, %c0_157] : memref<9x8x8xbf16, #tpu.memory_space<vmem>>, vector<1x8x8xbf16>
    %158 = vector.shape_cast %157 : vector<1x8x8xbf16> to vector<8x8xbf16>
    %cst_158 = arith.constant dense<0.000000e+00> : vector<128x8xf32>
    %159 = tpu.matmul %156, %158, %cst_158 {dimension_numbers = #tpu.dot_dimension_numbers<[1], [0], [0], [1], [0, 0, 1, 1], [], []>} : vector<128x8xbf16>, vector<8x8xbf16>, vector<128x8xf32> -> vector<128x8xf32>
    %160 = arith.addf %153, %159 : vector<128x8xf32>
    %c0_159 = arith.constant 0 : index
    %c2_160 = arith.constant 2 : index
    %c0_161 = arith.constant 0 : index
    %c0_162 = arith.constant 0 : index
    %161 = vector.load %arg10[%c0_159, %c2_160, %c0_161, %c0_162] : memref<2x10x10x8xf32, #tpu.memory_space<vmem>>, vector<2x8x8x8xf32>
    %162 = vector.shape_cast %161 : vector<2x8x8x8xf32> to vector<128x8xf32>
    %163 = arith.truncf %162 : vector<128x8xf32> to vector<128x8xbf16>
    %c6_163 = arith.constant 6 : index
    %c0_164 = arith.constant 0 : index
    %c0_165 = arith.constant 0 : index
    %164 = vector.load %arg5[%c6_163, %c0_164, %c0_165] : memref<9x8x8xbf16, #tpu.memory_space<vmem>>, vector<1x8x8xbf16>
    %165 = vector.shape_cast %164 : vector<1x8x8xbf16> to vector<8x8xbf16>
    %cst_166 = arith.constant dense<0.000000e+00> : vector<128x8xf32>
    %166 = tpu.matmul %163, %165, %cst_166 {dimension_numbers = #tpu.dot_dimension_numbers<[1], [0], [0], [1], [0, 0, 1, 1], [], []>} : vector<128x8xbf16>, vector<8x8xbf16>, vector<128x8xf32> -> vector<128x8xf32>
    %167 = arith.addf %160, %166 : vector<128x8xf32>
    %c0_167 = arith.constant 0 : index
    %c2_168 = arith.constant 2 : index
    %c1_169 = arith.constant 1 : index
    %c0_170 = arith.constant 0 : index
    %168 = vector.load %arg10[%c0_167, %c2_168, %c1_169, %c0_170] : memref<2x10x10x8xf32, #tpu.memory_space<vmem>>, vector<2x8x8x8xf32>
    %169 = vector.shape_cast %168 : vector<2x8x8x8xf32> to vector<128x8xf32>
    %170 = arith.truncf %169 : vector<128x8xf32> to vector<128x8xbf16>
    %c7_171 = arith.constant 7 : index
    %c0_172 = arith.constant 0 : index
    %c0_173 = arith.constant 0 : index
    %171 = vector.load %arg5[%c7_171, %c0_172, %c0_173] : memref<9x8x8xbf16, #tpu.memory_space<vmem>>, vector<1x8x8xbf16>
    %172 = vector.shape_cast %171 : vector<1x8x8xbf16> to vector<8x8xbf16>
    %cst_174 = arith.constant dense<0.000000e+00> : vector<128x8xf32>
    %173 = tpu.matmul %170, %172, %cst_174 {dimension_numbers = #tpu.dot_dimension_numbers<[1], [0], [0], [1], [0, 0, 1, 1], [], []>} : vector<128x8xbf16>, vector<8x8xbf16>, vector<128x8xf32> -> vector<128x8xf32>
    %174 = arith.addf %167, %173 : vector<128x8xf32>
    %c0_175 = arith.constant 0 : index
    %c2_176 = arith.constant 2 : index
    %c2_177 = arith.constant 2 : index
    %c0_178 = arith.constant 0 : index
    %175 = vector.load %arg10[%c0_175, %c2_176, %c2_177, %c0_178] : memref<2x10x10x8xf32, #tpu.memory_space<vmem>>, vector<2x8x8x8xf32>
    %176 = vector.shape_cast %175 : vector<2x8x8x8xf32> to vector<128x8xf32>
    %177 = arith.truncf %176 : vector<128x8xf32> to vector<128x8xbf16>
    %c8_179 = arith.constant 8 : index
    %c0_180 = arith.constant 0 : index
    %c0_181 = arith.constant 0 : index
    %178 = vector.load %arg5[%c8_179, %c0_180, %c0_181] : memref<9x8x8xbf16, #tpu.memory_space<vmem>>, vector<1x8x8xbf16>
    %179 = vector.shape_cast %178 : vector<1x8x8xbf16> to vector<8x8xbf16>
    %cst_182 = arith.constant dense<0.000000e+00> : vector<128x8xf32>
    %180 = tpu.matmul %177, %179, %cst_182 {dimension_numbers = #tpu.dot_dimension_numbers<[1], [0], [0], [1], [0, 0, 1, 1], [], []>} : vector<128x8xbf16>, vector<8x8xbf16>, vector<128x8xf32> -> vector<128x8xf32>
    %181 = arith.addf %174, %180 : vector<128x8xf32>
    %c0_183 = arith.constant 0 : index
    %c0_184 = arith.constant 0 : index
    %182 = vector.load %arg6[%c0_183, %c0_184] : memref<1x8xf32, #tpu.memory_space<vmem>>, vector<1x8xf32>
    %183 = vector.broadcast %182 : vector<1x8xf32> to vector<128x8xf32>
    %184 = arith.addf %181, %183 : vector<128x8xf32>
    %c0_185 = arith.constant 0 : index
    %c0_186 = arith.constant 0 : index
    %185 = vector.load %arg7[%c0_185, %c0_186] : memref<1x8xf32, #tpu.memory_space<vmem>>, vector<1x8xf32>
    %c0_187 = arith.constant 0 : index
    %c0_188 = arith.constant 0 : index
    %186 = vector.load %arg8[%c0_187, %c0_188] : memref<1x8xf32, #tpu.memory_space<vmem>>, vector<1x8xf32>
    %cst_189 = arith.constant dense<0.000000e+00> : vector<8xf32>
    %187 = vector.multi_reduction <add>, %184, %cst_189 [0] : vector<128x8xf32> to vector<8xf32>
    %188 = vector.shape_cast %187 : vector<8xf32> to vector<1x8xf32>
    %cst_190 = arith.constant 7.812500e-03 : f32
    %189 = vector.broadcast %cst_190 : f32 to vector<1x8xf32>
    %190 = arith.mulf %188, %189 : vector<1x8xf32>
    %191 = vector.broadcast %190 : vector<1x8xf32> to vector<128x8xf32>
    %192 = arith.subf %184, %191 : vector<128x8xf32>
    %193 = arith.mulf %192, %192 : vector<128x8xf32>
    %cst_191 = arith.constant dense<0.000000e+00> : vector<8xf32>
    %194 = vector.multi_reduction <add>, %193, %cst_191 [0] : vector<128x8xf32> to vector<8xf32>
    %195 = vector.shape_cast %194 : vector<8xf32> to vector<1x8xf32>
    %cst_192 = arith.constant 7.812500e-03 : f32
    %196 = vector.broadcast %cst_192 : f32 to vector<1x8xf32>
    %197 = arith.mulf %195, %196 : vector<1x8xf32>
    %cst_193 = arith.constant 9.99999974E-6 : f32
    %198 = vector.broadcast %cst_193 : f32 to vector<1x8xf32>
    %199 = arith.addf %197, %198 : vector<1x8xf32>
    %200 = math.rsqrt %199 : vector<1x8xf32>
    %201 = arith.mulf %200, %185 : vector<1x8xf32>
    %202 = vector.broadcast %201 : vector<1x8xf32> to vector<128x8xf32>
    %203 = arith.mulf %192, %202 : vector<128x8xf32>
    %204 = vector.broadcast %186 : vector<1x8xf32> to vector<128x8xf32>
    %205 = arith.addf %203, %204 : vector<128x8xf32>
    %cst_194 = arith.constant 0.000000e+00 : f32
    %206 = vector.broadcast %cst_194 : f32 to vector<128x8xf32>
    %207 = arith.maximumf %205, %206 : vector<128x8xf32>
    %208 = vector.shape_cast %207 : vector<128x8xf32> to vector<2x8x8x8xf32>
    %c0_195 = arith.constant 0 : index
    %c0_196 = arith.constant 0 : index
    %c0_197 = arith.constant 0 : index
    %c0_198 = arith.constant 0 : index
    %209 = vector.load %arg9[%c0_195, %c0_196, %c0_197, %c0_198] : memref<2x8x8x8xf32, #tpu.memory_space<vmem>>, vector<2x8x8x8xf32>
    tpu.vector_store %arg9[%c0_195, %c0_196, %c0_197, %c0_198], %208 {strides = array<i32>} : memref<2x8x8x8xf32, #tpu.memory_space<vmem>>, vector<2x8x8x8xf32>,
    return
  }
}

</mosaic_0001>

<bundles_post_ra>
// kernel: down_block.1
= control target key start
LH: loop header
LB: loop body
LE: loop exit
PB: predicated region body
PF: predicated region fallthrough
CT: control target
= control target key end

     0   :  { %vm162_vm0 = vcmask 64512   ;;  %vm164_vm1 = vcmask 58368   ;;  %v4527_v3 = vmov 0.0   ;;  %vm173_vm2 = vcmask 57344   ;;  %s4528_s25 = smov 124   ;;  %s5884_s0 = inlined_call_operand.vmem [shape: f32[16,2,8,8], index: 0, kind: input, shape index: {}]   ;;  %s5885_s1 = inlined_call_operand.vmem [shape: bf16[9,4,8], index: 1, kind: input, shape index: {}]   ;;  %s5886_s2 = inlined_call_operand.vmem [shape: f32[1,8], index: 2, kind: input, shape index: {}]   ;;  %s5887_s5 = inlined_call_operand.vmem [shape: bf16[9,8,8], index: 5, kind: input, shape index: {}]   ;;  %s5888_s3 = inlined_call_operand.vmem [shape: f32[1,8], index: 3, kind: input, shape index: {}]   ;;  %s5889_s4 = inlined_call_operand.vmem [shape: f32[1,8], index: 4, kind: input, shape index: {}]   ;;  %s5890_s6 = inlined_call_operand.vmem [shape: f32[1,8], index: 6, kind: input, shape index: {}]   ;;  %s5891_s7 = inlined_call_operand.vmem [shape: f32[1,8], index: 7, kind: input, shape index: {}]   ;;  %s5892_s8 = inlined_call_operand.vmem [shape: f32[1,8], index: 8, kind: input, shape index: {}]   ;;  %s5893_s9 = inlined_call_operand.vmem [shape: f32[2,8,8,8], index: 9, kind: output, shape index: {}]  }
   0x1   :  { %v35_v0 = vld [vmem:[%s5884_s0 + $0x20] sm:$0xff]  ;;  %v3583_v1 = vld [vmem:[%s5884_s0 + $0x28] sm:$0xff]  ;;  %163 = vst.msk [vmem:[#allocation2] sm:$0xff] %vm162_vm0, %v4527_v3  ;;  %166 = vst.msk [vmem:[#allocation2 + $0xa0] sm:$0xff] %vm162_vm0, %v4527_v3  ;;  %vm307_vm3 = vcmask 1041408   ;;  %vm215_vm4 = vcmask 31744  }
   0x2   :  { %v33_v2 = vld [vmem:[%s5884_s0] sm:$0xff]  ;;  %165 = vst.msk [vmem:[#allocation2 + $0x8] sm:$0x3] %vm164_vm1, %v4527_v3  ;;  %167 = vst.msk [vmem:[#allocation2 + $0xa8] sm:$0x3] %vm164_vm1, %v4527_v3  ;;  %v4592_v4 = vmax.f32 %v35_v0, %v3583_v1  ;;  %v3581_v5 = vld [vmem:[%s5884_s0 + $0x8] sm:$0xff] }
   0x3   :  { %169 = vst.msk [vmem:[#allocation2 + $0x90] sm:$0xff] %vm162_vm0, %v4527_v3  ;;  %171 = vst.msk [vmem:[#allocation2 + $0x130] sm:$0xff] %vm162_vm0, %v4527_v3  ;;  %v36_v6 = vld [vmem:[%s5884_s0 + $0x30] sm:$0xff]  ;;  %v3584_v7 = vld [vmem:[%s5884_s0 + $0x38] sm:$0xff]  ;;  %v4643_v8 = vmax.f32 %v33_v2, %v3581_v5  ;;  %vm1980_vm5 = vcmask 1043456  }
   0x4   :  { %170 = vst.msk [vmem:[#allocation2 + $0x98] sm:$0x3] %vm164_vm1, %v4527_v3  ;;  %172 = vst.msk [vmem:[#allocation2 + $0x138] sm:$0x3] %vm164_vm1, %v4527_v3  ;;  %v34_v9 = vld [vmem:[%s5884_s0 + $0x10] sm:$0xff]  ;;  %v3582_v10 = vld [vmem:[%s5884_s0 + $0x18] sm:$0xff]  ;;  %102 = vrot.lane.b32.xlu1 %v4592_v4, %s4528_s25  ;;  %v4653_v11 = vmax.f32 %v36_v6, %v3584_v7 }
   0x5   :  { %174 = vst.msk [vmem:[#allocation2] sm:$0x1] %vm173_vm2, %v4527_v3  ;;  %175 = vst.msk [vmem:[#allocation2 + $0x10] sm:$0x1] %vm173_vm2, %v4527_v3  ;;  %98 = vrot.lane.b32.xlu0 %v4643_v8, %s4528_s25  ;;  %v4657_v12 = vmax.f32 %v34_v9, %v3582_v10  ;;  %v38_v13 = vld [vmem:[%s5884_s0 + $0x50] sm:$0xff]  ;;  %v3586_v14 = vld [vmem:[%s5884_s0 + $0x58] sm:$0xff] }
   0x6   :  { %176 = vst.msk [vmem:[#allocation2 + $0x20] sm:$0x1] %vm173_vm2, %v4527_v3  ;;  %177 = vst.msk [vmem:[#allocation2 + $0x30] sm:$0x1] %vm173_vm2, %v4527_v3  ;;  %v37_v15 = vld [vmem:[%s5884_s0 + $0x40] sm:$0xff]  ;;  %v3585_v16 = vld [vmem:[%s5884_s0 + $0x48] sm:$0xff]  ;;  %v4673_v17 = vmax.f32 %v38_v13, %v3586_v14 }
   0x7   :  { %178 = vst.msk [vmem:[#allocation2 + $0x40] sm:$0x1] %vm173_vm2, %v4527_v3  ;;  %179 = vst.msk [vmem:[#allocation2 + $0x50] sm:$0x1] %vm173_vm2, %v4527_v3  ;;  %v4677_v18 = vmax.f32 %v37_v15, %v3585_v16  ;;  %v41_v19 = vld [vmem:[%s5884_s0 + $0x80] sm:$0xff]  ;;  %v3589_v20 = vld [vmem:[%s5884_s0 + $0x88] sm:$0xff] }
   0x8   :  { %180 = vst.msk [vmem:[#allocation2 + $0x60] sm:$0x1] %vm173_vm2, %v4527_v3  ;;  %181 = vst.msk [vmem:[#allocation2 + $0x70] sm:$0x1] %vm173_vm2, %v4527_v3  ;;  %104 = vrot.lane.b32.xlu1 %v4653_v11, %s4528_s25  ;;  %v39_v21 = vld [vmem:[%s5884_s0 + $0x60] sm:$0xff]  ;;  %v3587_v22 = vld [vmem:[%s5884_s0 + $0x68] sm:$0xff]  ;;  %v4696_v24 = vmax.f32 %v41_v19, %v3589_v20 }
   0x9   :  { %182 = vst.msk [vmem:[#allocation2 + $0x80] sm:$0x1] %vm173_vm2, %v4527_v3  ;;  %183 = vst.msk [vmem:[#allocation2 + $0x90] sm:$0x1] %vm173_vm2, %v4527_v3  ;;  %100 = vrot.lane.b32.xlu0 %v4657_v12, %s4528_s25  ;;  %v3597_v23 = vld [vmem:[%s5885_s1 + $0x2] sm:$0x3]  ;;  %v4707_v27 = vmax.f32 %v39_v21, %v3587_v22 }
   0xa   :  { %184 = vst.msk [vmem:[#allocation2 + $0xa0] sm:$0x1] %vm173_vm2, %v4527_v3  ;;  %185 = vst.msk [vmem:[#allocation2 + $0xb0] sm:$0x1] %vm173_vm2, %v4527_v3  ;;  %4503 = vmatprep.subr.msk.bf16.mxu0 %vm307_vm3, %v3597_v23  ;;  %v309_v25 = vsel %vm307_vm3, %v3597_v23, 0  ;;  %v43_v28 = vld [vmem:[%s5884_s0 + $0xa0] sm:$0xff] }
   0xb   :  { %186 = vst.msk [vmem:[#allocation2 + $0xc0] sm:$0x1] %vm173_vm2, %v4527_v3  ;;  %187 = vst.msk [vmem:[#allocation2 + $0xd0] sm:$0x1] %vm173_vm2, %v4527_v3  ;;  %v4703_v26 = vld [vmem:[%s5885_s1] sm:$0x3]  ;;  %3924 = vmatpush3.bf16.msra.mxu0 %v309_v25 }
   0xc   :  { %188 = vst.msk [vmem:[#allocation2 + $0xe0] sm:$0x1] %vm173_vm2, %v4527_v3  ;;  %189 = vst.msk [vmem:[#allocation2 + $0xf0] sm:$0x1] %vm173_vm2, %v4527_v3  ;;  %108 = vrot.lane.b32.xlu1 %v4673_v17, %s4528_s25  ;;  %v3591_v29 = vld [vmem:[%s5884_s0 + $0xa8] sm:$0xff]  ;;  %v42_v30 = vld [vmem:[%s5884_s0 + $0x90] sm:$0xff]  ;;  %4504 = vmatprep.subr.msk.bf16.mxu0 %vm307_vm3, %v4703_v26 }
   0xd   :  { %190 = vst.msk [vmem:[#allocation2 + $0x100] sm:$0x1] %vm173_vm2, %v4527_v3  ;;  %191 = vst.msk [vmem:[#allocation2 + $0x110] sm:$0x1] %vm173_vm2, %v4527_v3  ;;  %106 = vrot.lane.b32.xlu0 %v4677_v18, %s4528_s25  ;;  %v3590_v31 = vld [vmem:[%s5884_s0 + $0x98] sm:$0xff]  ;;  %v4725_v32 = vmax.f32 %v43_v28, %v3591_v29  ;;  %v45_v34 = vld [vmem:[%s5884_s0 + $0xc0] sm:$0xff] }
   0xe   :  { %192 = vst.msk [vmem:[#allocation2 + $0x120] sm:$0x1] %vm173_vm2, %v4527_v3  ;;  %193 = vst.msk [vmem:[#allocation2 + $0x130] sm:$0x1] %vm173_vm2, %v4527_v3  ;;  %v4729_v33 = vmax.f32 %v42_v30, %v3590_v31  ;;  %v3593_v35 = vld [vmem:[%s5884_s0 + $0xc8] sm:$0xff]  ;;  %v44_v36 = vld [vmem:[%s5884_s0 + $0xb0] sm:$0xff] }
   0xf   :  { %194 = vst.msk [vmem:[#allocation2 + $0x9] sm:$0x1] %vm173_vm2, %v4527_v3  ;;  %195 = vst.msk [vmem:[#allocation2 + $0x19] sm:$0x1] %vm173_vm2, %v4527_v3  ;;  %v3592_v37 = vld [vmem:[%s5884_s0 + $0xb8] sm:$0xff]  ;;  %v4745_v38 = vmax.f32 %v45_v34, %v3593_v35  ;;  %v47_v40 = vld [vmem:[%s5884_s0 + $0xe0] sm:$0xff] }
  0x10   :  { %196 = vst.msk [vmem:[#allocation2 + $0x29] sm:$0x1] %vm173_vm2, %v4527_v3  ;;  %197 = vst.msk [vmem:[#allocation2 + $0x39] sm:$0x1] %vm173_vm2, %v4527_v3  ;;  %114 = vrot.lane.b32.xlu1 %v4696_v24, %s4528_s25  ;;  %v4749_v39 = vmax.f32 %v44_v36, %v3592_v37  ;;  %v3595_v41 = vld [vmem:[%s5884_s0 + $0xe8] sm:$0xff]  ;;  %v46_v42 = vld [vmem:[%s5884_s0 + $0xd0] sm:$0xff] }
  0x11   :  { %198 = vst.msk [vmem:[#allocation2 + $0x49] sm:$0x1] %vm173_vm2, %v4527_v3  ;;  %199 = vst.msk [vmem:[#allocation2 + $0x59] sm:$0x1] %vm173_vm2, %v4527_v3  ;;  %110 = vrot.lane.b32.xlu0 %v4707_v27, %s4528_s25  ;;  %v3594_v43 = vld [vmem:[%s5884_s0 + $0xd8] sm:$0xff]  ;;  %v4765_v44 = vmax.f32 %v47_v40, %v3595_v41  ;;  %v48_v46 = vld [vmem:[%s5884_s0 + $0xf0] sm:$0xff] }
  0x12   :  { %200 = vst.msk [vmem:[#allocation2 + $0x69] sm:$0x1] %vm173_vm2, %v4527_v3  ;;  %201 = vst.msk [vmem:[#allocation2 + $0x79] sm:$0x1] %vm173_vm2, %v4527_v3  ;;  %v4769_v45 = vmax.f32 %v46_v42, %v3594_v43  ;;  %v3596_v47 = vld [vmem:[%s5884_s0 + $0xf8] sm:$0xff]  ;;  %v40_v48 = vld [vmem:[%s5884_s0 + $0x70] sm:$0xff] }
  0x13   :  { %202 = vst.msk [vmem:[#allocation2 + $0x89] sm:$0x1] %vm173_vm2, %v4527_v3  ;;  %203 = vst.msk [vmem:[#allocation2 + $0x99] sm:$0x1] %vm173_vm2, %v4527_v3  ;;  %v3588_v49 = vld [vmem:[%s5884_s0 + $0x78] sm:$0xff]  ;;  %v4785_v50 = vmax.f32 %v48_v46, %v3596_v47  ;;  %v257_v63 = vld [vmem:[#allocation2 + $0x1] sm:$0xff] }
  0x14   :  { %204 = vst.msk [vmem:[#allocation2 + $0xa9] sm:$0x1] %vm173_vm2, %v4527_v3  ;;  %205 = vst.msk [vmem:[#allocation2 + $0xb9] sm:$0x1] %vm173_vm2, %v4527_v3  ;;  %118 = vrot.lane.b32.xlu1 %v4725_v32, %s4528_s25  ;;  %v4789_v51 = vmax.f32 %v40_v48, %v3588_v49  ;;  %v3614_v14 = vld [vmem:[%s5885_s1 + $0x4] sm:$0x3] }
  0x15   :  { %206 = vst.msk [vmem:[#allocation2 + $0xc9] sm:$0x1] %vm173_vm2, %v4527_v3  ;;  %207 = vst.msk [vmem:[#allocation2 + $0xd9] sm:$0x1] %vm173_vm2, %v4527_v3  ;;  %116 = vrot.lane.b32.xlu0 %v4729_v33, %s4528_s25  ;;  %v265_v20 = vld [vmem:[#allocation2 + $0xa1] sm:$0xff] }
  0x16   :  { %208 = vst.msk [vmem:[#allocation2 + $0xe9] sm:$0x1] %vm173_vm2, %v4527_v3  ;;  %209 = vst.msk [vmem:[#allocation2 + $0xf9] sm:$0x1] %vm173_vm2, %v4527_v3  ;;  %v232_v46 = vld [vmem:[#allocation2] sm:$0xff] }
  0x17   :  { %210 = vst.msk [vmem:[#allocation2 + $0x109] sm:$0x1] %vm173_vm2, %v4527_v3  ;;  %211 = vst.msk [vmem:[#allocation2 + $0x119] sm:$0x1] %vm173_vm2, %v4527_v3 }
  0x18   :  { %212 = vst.msk [vmem:[#allocation2 + $0x129] sm:$0x1] %vm173_vm2, %v4527_v3  ;;  %213 = vst.msk [vmem:[#allocation2 + $0x139] sm:$0x1] %vm173_vm2, %v4527_v3  ;;  %122 = vrot.lane.b32.xlu1 %v4745_v38, %s4528_s25 }
  0x19   :  { %120 = vrot.lane.b32.xlu0 %v4749_v39, %s4528_s25 }
  0x1c   :  { %126 = vrot.lane.b32.xlu1 %v4765_v44, %s4528_s25 }
  0x1d   :  { %124 = vrot.lane.b32.xlu0 %v4769_v45, %s4528_s25 }
  0x20   :  { %128 = vrot.lane.b32.xlu1 %v4785_v50, %s4528_s25 }
  0x21   :  { %112 = vrot.lane.b32.xlu0 %v4789_v51, %s4528_s25 }
  0x76   :  { %v103_v52 = vpop.permute.xlu1 %102 }
  0x77   :  { %v148_v53 = vmax.f32 %v4592_v4, %v103_v52  ;;  %v99_v54 = vpop.permute.xlu0 %98 }
  0x78   :  { %v146_v55 = vmax.f32 %v4643_v8, %v99_v54 }
  0x79   :  { %218 = vst.msk [vmem:[#allocation2 + $0x31] sm:$0xff] %vm215_vm4, %v148_v53  ;;  %v583_v53 = vsel %vm307_vm3, %v3614_v14, 0 }
  0x7a   :  { %216 = vst.msk [vmem:[#allocation2 + $0x11] sm:$0xff] %vm215_vm4, %v146_v55  ;;  %v105_v56 = vpop.permute.xlu1 %104 }
  0x7b   :  { %v149_v57 = vmax.f32 %v4653_v11, %v105_v56  ;;  %v101_v58 = vpop.permute.xlu0 %100  ;;  %v433_v11 = vsel %vm307_vm3, %v4703_v26, 0  ;;  %v3623_v56 = vld [vmem:[%s5885_s1 + $0x6] sm:$0x3] }
  0x7c   :  { %v147_v59 = vmax.f32 %v4657_v12, %v101_v58  ;;  %v240_v58 = vld [vmem:[#allocation2 + $0xa0] sm:$0xff] }
  0x7d   :  { %219 = vst.msk [vmem:[#allocation2 + $0x41] sm:$0xff] %vm215_vm4, %v149_v57 }
  0x7e   :  { %217 = vst.msk [vmem:[#allocation2 + $0x21] sm:$0xff] %vm215_vm4, %v147_v59  ;;  %v109_v60 = vpop.permute.xlu1 %108 }
  0x7f   :  { %v151_v61 = vmax.f32 %v4673_v17, %v109_v60  ;;  %v107_v62 = vpop.permute.xlu0 %106 }
  0x80   :  { %v150_v0 = vmax.f32 %v4677_v18, %v107_v62  ;;  %v4811_v6 = vld [vmem:[#allocation2 + $0x31] sm:$0xff] }
  0x81   :  { %221 = vst.msk [vmem:[#allocation2 + $0x61] sm:$0xff] %vm215_vm4, %v151_v61  ;;  %v4806_v1 = vld [vmem:[#allocation2 + $0x11] sm:$0xff] }
  0x82   :  { %220 = vst.msk [vmem:[#allocation2 + $0x51] sm:$0xff] %vm215_vm4, %v150_v0  ;;  %v115_v2 = vpop.permute.xlu1 %114  ;;  %v273_v3 = vpack.c.bf16 %v4806_v1, %v257_v63  ;;  %v4899_v47 = vld [vmem:[#allocation2 + $0x10] sm:$0xff] }
  0x83   :  { %v154_v4 = vmax.f32 %v4696_v24, %v115_v2  ;;  %v111_v5 = vpop.permute.xlu0 %110  ;;  %v248_v48 = vpack.c.bf16 %v4899_v47, %v232_v46 }
  0x84   :  { %v152_v7 = vmax.f32 %v4707_v27, %v111_v5  ;;  %3925 = vmatprep.mubr.msk.bf16.mxu0 %vm215_vm4, %v273_v3  ;;  %v4833_v16 = vld [vmem:[#allocation2 + $0x41] sm:$0xff] }
  0x85   :  { %224 = vst.msk [vmem:[#allocation2 + $0xb1] sm:$0xff] %vm215_vm4, %v154_v4  ;;  %v4816_v8 = vld [vmem:[#allocation2 + $0x21] sm:$0xff] }
  0x86   :  { %222 = vst.msk [vmem:[#allocation2 + $0x71] sm:$0xff] %vm215_vm4, %v152_v7  ;;  %v119_v9 = vpop.permute.xlu1 %118  ;;  %v4821_v10 = vpack.c.bf16 %v4811_v6, %v4816_v8  ;;  %v4905_v49 = vld [vmem:[#allocation2 + $0x20] sm:$0xff] }
  0x87   :  { %v156_v12 = vmax.f32 %v4725_v32, %v119_v9  ;;  %v117_v13 = vpop.permute.xlu0 %116  ;;  %v4916_v54 = vld [vmem:[#allocation2 + $0x40] sm:$0xff] }
  0x88   :  { %v155_v15 = vmax.f32 %v4729_v33, %v117_v13  ;;  %3926 = vmatmul.mubr.msk.bf16.vlgmr.msra.gmra.mrb[0].mxu0 %vm215_vm4, %v4821_v10  ;;  %v4850_v25 = vld [vmem:[#allocation2 + $0x61] sm:$0xff] }
  0x89   :  { %226 = vst.msk [vmem:[#allocation2 + $0xd1] sm:$0xff] %vm215_vm4, %v156_v12  ;;  %3942 = vmatpush3.bf16.msra.mxu0 %v433_v11  ;;  %v4835_v17 = vld [vmem:[#allocation2 + $0x51] sm:$0xff]  ;;  %v238_v60 = vld [vmem:[#allocation2 + $0x60] sm:$0xff] }
  0x8a   :  { %225 = vst.msk [vmem:[#allocation2 + $0xc1] sm:$0xff] %vm215_vm4, %v155_v15  ;;  %v123_v18 = vpop.permute.xlu1 %122  ;;  %v4840_v19 = vpack.c.bf16 %v4835_v17, %v4833_v16  ;;  %4505 = vmatprep.subr.msk.bf16.mxu0 %vm307_vm3, %v3614_v14  ;;  %v532_v9 = vld [vmem:[#allocation2 + $0x2] sm:$0xff]  ;;  %v4957_v11 = vld [vmem:[#allocation2 + $0x12] sm:$0xff] }
  0x8b   :  { %v158_v21 = vmax.f32 %v4745_v38, %v123_v18  ;;  %v121_v22 = vpop.permute.xlu0 %120  ;;  %v548_v14 = vpack.c.bf16 %v4957_v11, %v532_v9  ;;  %v4966_v15 = vld [vmem:[#allocation2 + $0x22] sm:$0xff]  ;;  %v4968_v18 = vld [vmem:[#allocation2 + $0x32] sm:$0xff] }
  0x8c   :  { %v157_v23 = vmax.f32 %v4749_v39, %v121_v22  ;;  %3929 = vmatprep.mubr.msk.bf16.mxu0 %vm215_vm4, %v4840_v19  ;;  %v4847_v24 = vld [vmem:[#allocation2 + $0xb1] sm:$0xff]  ;;  %v749_v22 = vsel %vm307_vm3, %v3623_v56, 0 }
  0x8d   :  { %228 = vst.msk [vmem:[#allocation2 + $0xf1] sm:$0xff] %vm215_vm4, %v158_v21  ;;  %v4852_v26 = vld [vmem:[#allocation2 + $0x71] sm:$0xff]  ;;  %v277_v27 = vpack.c.bf16 %v4847_v24, %v265_v20  ;;  %v4974_v21 = vpack.c.bf16 %v4968_v18, %v4966_v15 }
  0x8e   :  { %227 = vst.msk [vmem:[#allocation2 + $0xe1] sm:$0xff] %vm215_vm4, %v157_v23  ;;  %v127_v28 = vpop.permute.xlu1 %126  ;;  %v4858_v29 = vpack.c.bf16 %v4852_v26, %v4850_v25  ;;  %v4930_v57 = vld [vmem:[#allocation2 + $0x70] sm:$0xff]  ;;  %v4977_v23 = vld [vmem:[#allocation2 + $0x42] sm:$0xff] }
  0x8f   :  { %v160_v30 = vmax.f32 %v4765_v44, %v127_v28  ;;  %v125_v31 = vpop.permute.xlu0 %124  ;;  %v4932_v59 = vld [vmem:[#allocation2 + $0xb0] sm:$0xff]  ;;  %v4935_v61 = vpack.c.bf16 %v4930_v57, %v238_v60  ;;  %v3632_v28 = vld [vmem:[%s5885_s1 + $0x8] sm:$0x3] }
  0x90   :  { %v159_v32 = vmax.f32 %v4769_v45, %v125_v31  ;;  %3930 = vmatmul.mubr.msk.bf16.gmra.mrb[4].mxu0 %vm215_vm4, %v4858_v29  ;;  %v4866_v33 = vld [vmem:[#allocation2 + $0xd1] sm:$0xff]  ;;  %v252_v62 = vpack.c.bf16 %v4932_v59, %v240_v58  ;;  %v540_v31 = vld [vmem:[#allocation2 + $0xa2] sm:$0xff] }
  0x91   :  { %230 = vst.msk [vmem:[#allocation2 + $0x111] sm:$0xff] %vm215_vm4, %v160_v30  ;;  %3933 = vmatprep.mubr.msk.bf16.mxu0 %vm215_vm4, %v277_v27  ;;  %v4870_v37 = vld [vmem:[#allocation2 + $0xc1] sm:$0xff]  ;;  %v4941_v63 = vld [vmem:[#allocation2 + $0xd0] sm:$0xff] }
  0x92   :  { %229 = vst.msk [vmem:[#allocation2 + $0x101] sm:$0xff] %vm215_vm4, %v159_v32  ;;  %v129_v34 = vpop.permute.xlu1 %128  ;;  %v4875_v39 = vpack.c.bf16 %v4866_v33, %v4870_v37  ;;  %v242_v2 = vld [vmem:[#allocation2 + $0xc0] sm:$0xff]  ;;  %v4970_v20 = vld [vmem:[#allocation2 + $0x52] sm:$0xff] }
  0x93   :  { %v161_v35 = vmax.f32 %v4785_v50, %v129_v34  ;;  %v113_v36 = vpop.permute.xlu0 %112  ;;  %v4907_v50 = vld [vmem:[#allocation2 + $0x30] sm:$0xff]  ;;  %v4946_v3 = vpack.c.bf16 %v4941_v63, %v242_v2  ;;  %v4981_v27 = vpack.c.bf16 %v4970_v20, %v4977_v23  ;;  %v4995_v34 = vld [vmem:[#allocation2 + $0x62] sm:$0xff] }
  0x94   :  { %v153_v38 = vmax.f32 %v4789_v51, %v113_v36  ;;  %v4877_v40 = vld [vmem:[#allocation2 + $0xf1] sm:$0xff]  ;;  %v4913_v52 = vpack.c.bf16 %v4907_v50, %v4905_v49 }
  0x95   :  { %231 = vst.msk [vmem:[#allocation2 + $0x121] sm:$0xff] %vm215_vm4, %v161_v35  ;;  %v4880_v41 = vld [vmem:[#allocation2 + $0xe1] sm:$0xff]  ;;  %v4909_v51 = vld [vmem:[#allocation2 + $0x50] sm:$0xff] }
  0x96   :  { %223 = vst.msk [vmem:[#allocation2 + $0x81] sm:$0xff] %vm215_vm4, %v153_v38  ;;  %v4885_v42 = vpack.c.bf16 %v4877_v40, %v4880_v41  ;;  %v4920_v55 = vpack.c.bf16 %v4909_v51, %v4916_v54  ;;  %v4943_v0 = vld [vmem:[#allocation2 + $0xf0] sm:$0xff]  ;;  %v244_v4 = vld [vmem:[#allocation2 + $0xe0] sm:$0xff] }
  0x97   :  { %v4949_v5 = vpack.c.bf16 %v4943_v0, %v244_v4  ;;  %v4991_v30 = vld [vmem:[#allocation2 + $0x72] sm:$0xff] }
  0x98   :  { %3934 = vmatmul.mubr.msk.bf16.gmra.mrb[8].mxu0 %vm215_vm4, %v4875_v39  ;;  %v4891_v43 = vld [vmem:[#allocation2 + $0x111] sm:$0xff]  ;;  %v4999_v35 = vpack.c.bf16 %v4991_v30, %v4995_v34 }
  0x99   :  { %3937 = vmatprep.mubr.msk.bf16.mxu0 %vm215_vm4, %v4885_v42  ;;  %v4893_v44 = vld [vmem:[#allocation2 + $0x101] sm:$0xff]  ;;  %v4955_v7 = vld [vmem:[#allocation2 + $0x110] sm:$0xff] }
  0x9a   :  { %v4897_v45 = vpack.c.bf16 %v4891_v43, %v4893_v44  ;;  %v246_v12 = vld [vmem:[#allocation2 + $0x100] sm:$0xff]  ;;  %v4993_v32 = vld [vmem:[#allocation2 + $0xb2] sm:$0xff] }
  0x9b   :  { %v4960_v13 = vpack.c.bf16 %v4955_v7, %v246_v12  ;;  %v552_v36 = vpack.c.bf16 %v4993_v32, %v540_v31  ;;  %v5005_v38 = vld [vmem:[#allocation2 + $0xd2] sm:$0xff]  ;;  %v5027_v9 = vld [vmem:[#allocation2 + $0x102] sm:$0xff]  ;;  %v715_v31 = vpack.c.bf16 %v4916_v54, %v4907_v50  ;;  %v718_v50 = vpack.c.bf16 %v242_v2, %v4932_v59  ;;  %v3650_v2 = vld [vmem:[%s5885_s1 + $0xc] sm:$0x3] }
  0x9c   :  { %v5007_v46 = vld [vmem:[#allocation2 + $0xf2] sm:$0xff]  ;;  %v720_v54 = vpack.c.bf16 %v246_v12, %v4943_v0  ;;  %v881_v59 = vpack.c.bf16 %v4833_v16, %v4811_v6  ;;  %v882_v0 = vpack.c.bf16 %v4850_v25, %v4835_v17  ;;  %v884_v6 = vpack.c.bf16 %v4870_v37, %v4847_v24  ;;  %v879_v25 = vld [vmem:[#allocation2 + $0x121] sm:$0xff] }
  0x9d   :  { %v885_v16 = vpack.c.bf16 %v4880_v41, %v4866_v33  ;;  %v886_v17 = vpack.c.bf16 %v4893_v44, %v4877_v40  ;;  %v1046_v24 = vpack.c.bf16 %v4966_v15, %v4957_v11  ;;  %v1047_v33 = vpack.c.bf16 %v4977_v23, %v4968_v18  ;;  %v3659_v41 = vld [vmem:[%s5885_s1 + $0xe] sm:$0x3]  ;;  %v1045_v12 = vld [vmem:[#allocation2 + $0x122] sm:$0xff]  ;;  %v1204_v23 = vld [vmem:[#allocation2 + $0x90] sm:$0xff] }
  0x9e   :  { %v1248_v37 = vsel %vm307_vm3, %v3650_v2, 0  ;;  %v1048_v40 = vpack.c.bf16 %v4995_v34, %v4970_v20  ;;  %v1052_v11 = vpack.c.bf16 %v5027_v9, %v5007_v46  ;;  %v1414_v18 = vsel %vm307_vm3, %v3659_v41, 0  ;;  %v3668_v20 = vld [vmem:[%s5885_s1 + $0x10] sm:$0x3] }
  0xa0   :  { %3938 = vmatmul.mubr.msk.bf16.gmra.mrb[12].mxu0 %vm215_vm4, %v4897_v45 }
  0xa1   :  { %3943 = vmatprep.mubr.msk.bf16.mxu0 %vm215_vm4, %v248_v48  ;;  %v5009_v48 = vld [vmem:[#allocation2 + $0xc2] sm:$0xff] }
  0xa8   :  { %3944 = vmatmul.mubr.msk.bf16.vlgmr.msra.gmra.mrb[0].mxu0 %vm215_vm4, %v4913_v52 }
  0xa9   :  { %3960 = vmatpush3.bf16.msra.mxu0 %v583_v53  ;;  %3947 = vmatprep.mubr.msk.bf16.mxu0 %vm215_vm4, %v4920_v55  ;;  %v5013_v53 = vpack.c.bf16 %v5005_v38, %v5009_v48 }
  0xaa   :  { %4506 = vmatprep.subr.msk.bf16.mxu0 %vm307_vm3, %v3623_v56  ;;  %v5015_v56 = vld [vmem:[#allocation2 + $0xe2] sm:$0xff] }
  0xab   :  { %5901 = vst [vmem:[#allocation3_spill] sm:$0xff] %v5013_v53  ;;  %v5019_v58 = vpack.c.bf16 %v5007_v46, %v5015_v56 }
  0xad   :  { %5902 = vst [vmem:[#allocation4_spill] sm:$0xff] %v5019_v58 }
  0xb0   :  { %3948 = vmatmul.mubr.msk.bf16.gmra.mrb[4].mxu0 %vm215_vm4, %v4935_v61 }
  0xb1   :  { %3951 = vmatprep.mubr.msk.bf16.mxu0 %vm215_vm4, %v252_v62  ;;  %v5025_v62 = vld [vmem:[#allocation2 + $0x112] sm:$0xff] }
  0xb2   :  { %v1053_v15 = vpack.c.bf16 %v1045_v12, %v5025_v62 }
  0xb8   :  { %3952 = vmatmul.mubr.msk.bf16.gmra.mrb[8].mxu0 %vm215_vm4, %v4946_v3 }
  0xb9   :  { %3955 = vmatprep.mubr.msk.bf16.mxu0 %vm215_vm4, %v4949_v5 }
  0xc0   :  { %3956 = vmatmul.mubr.msk.bf16.gmra.mrb[12].mxu0 %vm215_vm4, %v4960_v13 }
  0xc1   :  { %3961 = vmatprep.mubr.msk.bf16.mxu0 %vm215_vm4, %v548_v14  ;;  %v5031_v14 = vpack.c.bf16 %v5025_v62, %v5027_v9 }
  0xc8   :  { %3962 = vmatmul.mubr.msk.bf16.vlgmr.msra.gmra.mrb[0].mxu0 %vm215_vm4, %v4974_v21 }
  0xc9   :  { %3978 = vmatpush3.bf16.msra.mxu0 %v749_v22  ;;  %3965 = vmatprep.mubr.msk.bf16.mxu0 %vm215_vm4, %v4981_v27  ;;  %v714_v22 = vpack.c.bf16 %v4905_v49, %v4899_v47  ;;  %v5048_v47 = vld [vmem:[#allocation2 + $0x80] sm:$0xff] }
  0xca   :  { %4507 = vmatprep.subr.msk.bf16.mxu0 %vm307_vm3, %v3632_v28  ;;  %v717_v49 = vpack.c.bf16 %v5048_v47, %v4930_v57  ;;  %v880_v57 = vpack.c.bf16 %v4816_v8, %v4806_v1  ;;  %v871_v1 = vld [vmem:[#allocation2 + $0x81] sm:$0xff] }
  0xcb   :  { %v883_v8 = vpack.c.bf16 %v871_v1, %v4852_v26  ;;  %v887_v26 = vpack.c.bf16 %v879_v25, %v4891_v43  ;;  %v1037_v43 = vld [vmem:[#allocation2 + $0x82] sm:$0xff] }
  0xcc   :  { %v1049_v44 = vpack.c.bf16 %v1037_v43, %v4991_v30  ;;  %v1216_v30 = vpack.c.bf16 %v1204_v23, %v5048_v47 }
  0xd0   :  { %3966 = vmatmul.mubr.msk.bf16.gmra.mrb[4].mxu0 %vm215_vm4, %v4999_v35 }
  0xd1   :  { %3969 = vmatprep.mubr.msk.bf16.mxu0 %vm215_vm4, %v552_v36  ;;  %v915_v36 = vsel %vm307_vm3, %v3632_v28, 0 }
  0xd8   :  { %3970 = vmatmul.mubr.msk.bf16.gmra.mrb[8].mxu0 %vm215_vm4, %v5013_v53  ;;  %v3641_v53 = vld [vmem:[%s5885_s1 + $0xa] sm:$0x3] }
  0xd9   :  { %3973 = vmatprep.mubr.msk.bf16.mxu0 %vm215_vm4, %v5019_v58  ;;  %v716_v58 = vpack.c.bf16 %v238_v60, %v4909_v51  ;;  %v719_v51 = vpack.c.bf16 %v244_v4, %v4941_v63  ;;  %v5059_v60 = vld [vmem:[#allocation2 + $0x120] sm:$0xff]  ;;  %v1081_v63 = vsel %vm307_vm3, %v3641_v53, 0  ;;  %v1050_v4 = vpack.c.bf16 %v5009_v48, %v4993_v32 }
  0xda   :  { %v721_v28 = vpack.c.bf16 %v5059_v60, %v4955_v7  ;;  %v1051_v7 = vpack.c.bf16 %v5015_v56, %v5005_v38 }
  0xe0   :  { %3974 = vmatmul.mubr.msk.bf16.gmra.mrb[12].mxu0 %vm215_vm4, %v5031_v14 }
  0xe1   :  { %3979 = vmatprep.mubr.msk.bf16.mxu0 %vm215_vm4, %v714_v22 }
  0xe8   :  { %3980 = vmatmul.mubr.msk.bf16.vlgmr.msra.gmra.mrb[0].mxu0 %vm215_vm4, %v715_v31 }
  0xe9   :  { %3996 = vmatpush3.bf16.msra.mxu0 %v915_v36  ;;  %3983 = vmatprep.mubr.msk.bf16.mxu0 %vm215_vm4, %v716_v58 }
  0xea   :  { %4508 = vmatprep.subr.msk.bf16.mxu0 %vm307_vm3, %v3641_v53 }
  0xf0   :  { %3984 = vmatmul.mubr.msk.bf16.gmra.mrb[4].mxu0 %vm215_vm4, %v717_v49 }
  0xf1   :  { %3987 = vmatprep.mubr.msk.bf16.mxu0 %vm215_vm4, %v718_v50 }
  0xf8   :  { %3988 = vmatmul.mubr.msk.bf16.gmra.mrb[8].mxu0 %vm215_vm4, %v719_v51 }
  0xf9   :  { %3991 = vmatprep.mubr.msk.bf16.mxu0 %vm215_vm4, %v720_v54 }
 0x100   :  { %3992 = vmatmul.mubr.msk.bf16.gmra.mrb[12].mxu0 %vm215_vm4, %v721_v28 }
 0x101   :  { %3997 = vmatprep.mubr.msk.bf16.mxu0 %vm215_vm4, %v880_v57 }
 0x108   :  { %3998 = vmatmul.mubr.msk.bf16.vlgmr.msra.gmra.mrb[0].mxu0 %vm215_vm4, %v881_v59 }
 0x109   :  { %4014 = vmatpush3.bf16.msra.mxu0 %v1081_v63  ;;  %4001 = vmatprep.mubr.msk.bf16.mxu0 %vm215_vm4, %v882_v0 }
 0x10a   :  { %4509 = vmatprep.subr.msk.bf16.mxu0 %vm307_vm3, %v3650_v2  ;;  %v5205_v2 = vld [vmem:[%s5887_s5] sm:$0xf] }
 0x110   :  { %4002 = vmatmul.mubr.msk.bf16.gmra.mrb[4].mxu0 %vm215_vm4, %v883_v8 }
 0x111   :  { %4005 = vmatprep.mubr.msk.bf16.mxu0 %vm215_vm4, %v884_v6 }
 0x118   :  { %4006 = vmatmul.mubr.msk.bf16.gmra.mrb[8].mxu0 %vm215_vm4, %v885_v16 }
 0x119   :  { %4009 = vmatprep.mubr.msk.bf16.mxu0 %vm215_vm4, %v886_v17 }
 0x120   :  { %4010 = vmatmul.mubr.msk.bf16.gmra.mrb[12].mxu0 %vm215_vm4, %v887_v26 }
 0x121   :  { %4015 = vmatprep.mubr.msk.bf16.mxu0 %vm215_vm4, %v1046_v24 }
 0x128   :  { %4016 = vmatmul.mubr.msk.bf16.vlgmr.msra.gmra.mrb[0].mxu0 %vm215_vm4, %v1047_v33 }
 0x129   :  { %4032 = vmatpush3.bf16.msra.mxu0 %v1248_v37  ;;  %4019 = vmatprep.mubr.msk.bf16.mxu0 %vm215_vm4, %v1048_v40 }
 0x12a   :  { %4510 = vmatprep.subr.msk.bf16.mxu0 %vm307_vm3, %v3659_v41 }
 0x130   :  { %4020 = vmatmul.mubr.msk.bf16.gmra.mrb[4].mxu0 %vm215_vm4, %v1049_v44 }
 0x131   :  { %4023 = vmatprep.mubr.msk.bf16.mxu0 %vm215_vm4, %v1050_v4 }
 0x138   :  { %4024 = vmatmul.mubr.msk.bf16.gmra.mrb[8].mxu0 %vm215_vm4, %v1051_v7 }
 0x139   :  { %4027 = vmatprep.mubr.msk.bf16.mxu0 %vm215_vm4, %v1052_v11 }
 0x140   :  { %4028 = vmatmul.mubr.msk.bf16.gmra.mrb[12].mxu0 %vm215_vm4, %v1053_v15 }
 0x141   :  { %4033 = vmatprep.mubr.msk.bf16.mxu0 %vm215_vm4, %v4913_v52  ;;  %v1212_v52 = vld [vmem:[#allocation2 + $0x130] sm:$0xff] }
 0x148   :  { %4034 = vmatmul.mubr.msk.bf16.vlgmr.msra.gmra.mrb[0].mxu0 %vm215_vm4, %v4920_v55  ;;  %v1220_v55 = vpack.c.bf16 %v1212_v52, %v5059_v60 }
 0x149   :  { %4050 = vmatpush3.bf16.msra.mxu0 %v1414_v18  ;;  %4037 = vmatprep.mubr.msk.bf16.mxu0 %vm215_vm4, %v4935_v61  ;;  %v1580_v61 = vsel %vm307_vm3, %v3668_v20, 0 }
 0x14a   :  { %4511 = vmatprep.subr.msk.bf16.mxu0 %vm307_vm3, %v3668_v20 }
 0x150   :  { %4038 = vmatmul.mubr.msk.bf16.gmra.mrb[4].mxu0 %vm215_vm4, %v1216_v30 }
 0x151   :  { %4041 = vmatprep.mubr.msk.bf16.mxu0 %vm215_vm4, %v4946_v3  ;;  %v1370_v3 = vld [vmem:[#allocation2 + $0x91] sm:$0xff] }
 0x158   :  { %4042 = vmatmul.mubr.msk.bf16.gmra.mrb[8].mxu0 %vm215_vm4, %v4949_v5  ;;  %v1382_v5 = vpack.c.bf16 %v1370_v3, %v871_v1 }
 0x159   :  { %4045 = vmatprep.mubr.msk.bf16.mxu0 %vm215_vm4, %v4960_v13 }
 0x160   :  { %4046 = vmatmul.mubr.msk.bf16.gmra.mrb[12].mxu0 %vm215_vm4, %v1220_v55 }
 0x161   :  { %4051 = vmatprep.mubr.msk.bf16.mxu0 %vm215_vm4, %v4821_v10  ;;  %v1378_v10 = vld [vmem:[#allocation2 + $0x131] sm:$0xff] }
 0x162   :  { %v1386_v13 = vpack.c.bf16 %v1378_v10, %v879_v25 }
 0x168   :  { %4052 = vmatmul.mubr.msk.bf16.vlgmr.msra.gmra.mrb[0].mxu0 %vm215_vm4, %v4840_v19  ;;  %v1536_v19 = vld [vmem:[#allocation2 + $0x92] sm:$0xff] }
 0x169   :  { %4068 = vmatpush3.bf16.msra.mxu0 %v1580_v61  ;;  %4055 = vmatprep.mubr.msk.bf16.mxu0 %vm215_vm4, %v4858_v29  ;;  %v1548_v29 = vpack.c.bf16 %v1536_v19, %v1037_v43 }
 0x170   :  { %4056 = vmatmul.mubr.msk.bf16.gmra.mrb[4].mxu0 %vm215_vm4, %v1382_v5 }
 0x171   :  { %4059 = vmatprep.mubr.msk.bf16.mxu0 %vm215_vm4, %v4875_v39  ;;  %v5903_v39 = vld [vmem:[#allocation3_spill] sm:$0xff] }
 0x178   :  { %4060 = vmatmul.mubr.msk.bf16.gmra.mrb[8].mxu0 %vm215_vm4, %v4885_v42  ;;  %v5904_v42 = vld [vmem:[#allocation4_spill] sm:$0xff] }
 0x179   :  { %4063 = vmatprep.mubr.msk.bf16.mxu0 %vm215_vm4, %v4897_v45  ;;  %v1544_v45 = vld [vmem:[#allocation2 + $0x132] sm:$0xff] }
 0x180   :  { %4064 = vmatmul.mubr.msk.bf16.gmra.mrb[12].mxu0 %vm215_vm4, %v1386_v13 }
 0x181   :  { %4069 = vmatprep.mubr.msk.bf16.mxu0 %vm215_vm4, %v4974_v21  ;;  %v1552_v21 = vpack.c.bf16 %v1544_v45, %v1045_v12 }
 0x188   :  { %4070 = vmatmul.mubr.msk.bf16.vlgmr.msra.gmra.mrb[0].mxu0 %vm215_vm4, %v4981_v27  ;;  %v5171_v27 = vld [vmem:[%s5886_s2] ss:$0 sm:$0xff] }
 0x189   :  { %4073 = vmatprep.mubr.msk.bf16.mxu0 %vm215_vm4, %v4999_v35 }
 0x190   :  { %4074 = vmatmul.mubr.msk.bf16.gmra.mrb[4].mxu0 %vm215_vm4, %v1548_v29 }
 0x191   :  { %4077 = vmatprep.mubr.msk.bf16.mxu0 %vm215_vm4, %v5903_v39 }
 0x198   :  { %4078 = vmatmul.mubr.msk.bf16.gmra.mrb[8].mxu0 %vm215_vm4, %v5904_v42 }
 0x199   :  { %4081 = vmatprep.mubr.msk.bf16.mxu0 %vm215_vm4, %v5031_v14  ;;  %v3679_v14 = vld [vmem:[%s5887_s5 + $0x4] sm:$0xf] }
 0x19a   :  { %4512 = vmatprep.subr.msk.bf16.mxu1 %vm1980_vm5, %v3679_v14  ;;  %v1982_v36 = vsel %vm1980_vm5, %v3679_v14, 0 }
 0x19b   :  { %4086 = vmatpush3.bf16.msra.mxu1 %v1982_v36 }
 0x19c   :  { %4513 = vmatprep.subr.msk.bf16.mxu1 %vm1980_vm5, %v5205_v2 }
 0x1a0   :  { %4082 = vmatmul.mubr.msk.bf16.gmra.mrb[12].mxu0 %vm215_vm4, %v1552_v21 }
 0x25b   :  { %v4071_v32 = vpop.f32.mrb[0].mxu0 }
 0x25c   :  { %v1616_v34 = vpop.f32.mrb[1].mxu0  ;;  %v5177_v48 = vadd.f32 %v4071_v32, %v5171_v27 }
 0x25d   :  { %v5174_v35 = vadd.f32 %v5171_v27, %v1616_v34  ;;  %v4072_v38 = vpop.f32.mrb[2].mxu0 }
 0x25e   :  { %v1619_v46 = vpop.f32.mrb[3].mxu0  ;;  %v5185_v58 = vadd.f32 %v4072_v38, %v5171_v27  ;;  %v1723_v22 = vsel %vm162_vm0, %v5177_v48, 0.0 }
 0x25f   :  { %v5180_v53 = vadd.f32 %v5171_v27, %v1619_v46  ;;  %v1720_v56 = vsel %vm162_vm0, %v5174_v35, 0.0 }
 0x260   :  { %v1725_v50 = vsel %vm162_vm0, %v5185_v58, 0.0 }
 0x261   :  { %v1721_v62 = vsel %vm162_vm0, %v5180_v53, 0.0 }
 0x262   :  { %v1722_v9 = vadd.f32 %v1721_v62, %v1720_v56 }
 0x263   :  { %v4075_v31 = vpop.f32.mrb[4].mxu0 }
 0x264   :  { %v1724_v47 = vadd.f32 %v1723_v22, %v1722_v9  ;;  %v1632_v49 = vpop.f32.mrb[5].mxu0  ;;  %v1708_v57 = vadd.f32 %v4075_v31, %v5171_v27 }
 0x265   :  { %v1706_v51 = vadd.f32 %v5171_v27, %v1632_v49  ;;  %v4076_v54 = vpop.f32.mrb[6].mxu0 }
 0x266   :  { %v1726_v60 = vadd.f32 %v1725_v50, %v1724_v47  ;;  %v1635_v28 = vpop.f32.mrb[7].mxu0  ;;  %v1709_v1 = vadd.f32 %v4076_v54, %v5171_v27  ;;  %v1731_v16 = vsel %vm162_vm0, %v1708_v57, 0.0 }
 0x267   :  { %v1727_v59 = vsel %vm162_vm0, %v1706_v51, 0.0  ;;  %v1707_v63 = vadd.f32 %v5171_v27, %v1635_v28 }
 0x268   :  { %v1728_v0 = vadd.f32 %v1727_v59, %v1726_v60  ;;  %v1733_v24 = vsel %vm162_vm0, %v1709_v1, 0.0 }
 0x269   :  { %v1729_v8 = vsel %vm162_vm0, %v1707_v63, 0.0 }
 0x26a   :  { %v1730_v6 = vadd.f32 %v1729_v8, %v1728_v0 }
 0x26b   :  { %v4079_v17 = vpop.f32.mrb[8].mxu0 }
 0x26c   :  { %v1732_v25 = vadd.f32 %v1731_v16, %v1730_v6  ;;  %v1648_v26 = vpop.f32.mrb[9].mxu0  ;;  %v1712_v43 = vadd.f32 %v4079_v17, %v5171_v27 }
 0x26d   :  { %v1710_v33 = vadd.f32 %v5171_v27, %v1648_v26  ;;  %v4080_v37 = vpop.f32.mrb[10].mxu0 }
 0x26e   :  { %v1734_v40 = vadd.f32 %v1733_v24, %v1732_v25  ;;  %v1651_v41 = vpop.f32.mrb[11].mxu0  ;;  %v1713_v11 = vadd.f32 %v4080_v37, %v5171_v27  ;;  %v1739_v18 = vsel %vm162_vm0, %v1712_v43, 0.0 }
 0x26f   :  { %v1735_v44 = vsel %vm162_vm0, %v1710_v33, 0.0  ;;  %v1711_v4 = vadd.f32 %v5171_v27, %v1651_v41 }
 0x270   :  { %v1736_v7 = vadd.f32 %v1735_v44, %v1734_v40  ;;  %v1741_v52 = vsel %vm162_vm0, %v1713_v11, 0.0 }
 0x271   :  { %v1737_v12 = vsel %vm162_vm0, %v1711_v4, 0.0 }
 0x272   :  { %v1738_v15 = vadd.f32 %v1737_v12, %v1736_v7 }
 0x273   :  { %v4083_v20 = vpop.f32.mrb[12].mxu0 }
 0x274   :  { %v1740_v23 = vadd.f32 %v1739_v18, %v1738_v15  ;;  %v1664_v30 = vpop.f32.mrb[13].mxu0  ;;  %v1716_v10 = vadd.f32 %v4083_v20, %v5171_v27 }
 0x275   :  { %v1714_v55 = vadd.f32 %v5171_v27, %v1664_v30  ;;  %v4084_v61 = vpop.f32.mrb[14].mxu0 }
 0x276   :  { %v1742_v3 = vadd.f32 %v1741_v52, %v1740_v23  ;;  %v1667_v5 = vpop.f32.mrb[15].mxu0  ;;  %v1717_v39 = vadd.f32 %v4084_v61, %v5171_v27  ;;  %v1747_v21 = vsel %vm162_vm0, %v1716_v10, 0.0 }
 0x277   :  { %v1743_v13 = vsel %vm162_vm0, %v1714_v55, 0.0  ;;  %v1715_v19 = vadd.f32 %v5171_v27, %v1667_v5 }
 0x278   :  { %v1744_v29 = vadd.f32 %v1743_v13, %v1742_v3  ;;  %v1749_v34 = vsel %vm162_vm0, %v1717_v39, 0.0 }
 0x279   :  { %v1745_v42 = vsel %vm162_vm0, %v1715_v19, 0.0 }
 0x27a   :  { %v1746_v45 = vadd.f32 %v1745_v42, %v1744_v29 }
 0x27c   :  { %v1748_v32 = vadd.f32 %v1747_v21, %v1746_v45 }
 0x27e   :  { %v1750_v38 = vadd.f32 %v1749_v34, %v1748_v32 }
 0x280   :  { %v1751_v46 = vrot.slane %v1750_v38, 4 }
 0x282   :  { %v1752_v56 = vadd.f32 %v1751_v46, %v1750_v38 }
 0x284   :  { %v1753_v62 = vrot.slane %v1752_v56, 2 }
 0x286   :  { %v1754_v9 = vadd.f32 %v1753_v62, %v1752_v56 }
 0x288   :  { %v1755_v14 = vrot.slane %v1754_v9, 1 }
 0x28a   :  { %v1756_v22 = vadd.f32 %v1755_v14, %v1754_v9 }
 0x28c   :  { %v1757_v31 = vmul.f32 0.0078125, %v1756_v22 }
 0x28e   :  { %v5230_v36 = vsub.f32 %v5174_v35, %v1757_v31  ;;  %v5233_v27 = vsub.f32 %v5180_v53, %v1757_v31  ;;  %v5236_v47 = vsub.f32 %v5177_v48, %v1757_v31  ;;  %v5239_v49 = vsub.f32 %v5185_v58, %v1757_v31 }
 0x28f   :  { %v5241_v50 = vsub.f32 %v1706_v51, %v1757_v31  ;;  %v5243_v54 = vsub.f32 %v1707_v63, %v1757_v31  ;;  %v5245_v60 = vsub.f32 %v1708_v57, %v1757_v31  ;;  %v5247_v28 = vsub.f32 %v1709_v1, %v1757_v31 }
 0x290   :  { %v5249_v59 = vsub.f32 %v1710_v33, %v1757_v31  ;;  %v5251_v35 = vsub.f32 %v1711_v4, %v1757_v31  ;;  %v5253_v53 = vsub.f32 %v1712_v43, %v1757_v31  ;;  %v5255_v0 = vsub.f32 %v1713_v11, %v1757_v31 }
 0x291   :  { %v5257_v48 = vsub.f32 %v1714_v55, %v1757_v31  ;;  %v5259_v58 = vsub.f32 %v1715_v19, %v1757_v31  ;;  %v5261_v51 = vsub.f32 %v1716_v10, %v1757_v31  ;;  %v5263_v63 = vsub.f32 %v1717_v39, %v1757_v31 }
 0x292   :  { %v1774_v57 = vmul.f32 %v5230_v36, %v5230_v36  ;;  %v1775_v1 = vmul.f32 %v5233_v27, %v5233_v27  ;;  %v1776_v8 = vmul.f32 %v5236_v47, %v5236_v47  ;;  %v1777_v6 = vmul.f32 %v5239_v49, %v5239_v49 }
 0x293   :  { %v1778_v26 = vmul.f32 %v5241_v50, %v5241_v50  ;;  %v1779_v37 = vmul.f32 %v5243_v54, %v5243_v54  ;;  %v1780_v43 = vmul.f32 %v5245_v60, %v5245_v60  ;;  %v1781_v7 = vmul.f32 %v5247_v28, %v5247_v28 }
 0x294   :  { %v1790_v16 = vsel %vm162_vm0, %v1774_v57, 0.0  ;;  %v1791_v17 = vsel %vm162_vm0, %v1775_v1, 0.0  ;;  %v1793_v24 = vsel %vm162_vm0, %v1776_v8, 0.0  ;;  %v1795_v40 = vsel %vm162_vm0, %v1777_v6, 0.0 }
 0x295   :  { %v1792_v25 = vadd.f32 %v1791_v17, %v1790_v16  ;;  %v1797_v44 = vsel %vm162_vm0, %v1778_v26, 0.0  ;;  %v1799_v11 = vsel %vm162_vm0, %v1779_v37, 0.0  ;;  %v1782_v15 = vmul.f32 %v5249_v59, %v5249_v59  ;;  %v1718_v37 = vld [vmem:[%s5888_s3] sm:$0x1] }
 0x296   :  { %v1801_v18 = vsel %vm162_vm0, %v1780_v43, 0.0  ;;  %v1783_v23 = vmul.f32 %v5251_v35, %v5251_v35  ;;  %v1803_v30 = vsel %vm162_vm0, %v1781_v7, 0.0  ;;  %v1784_v55 = vmul.f32 %v5253_v53, %v5253_v53 }
 0x297   :  { %v1794_v33 = vadd.f32 %v1793_v24, %v1792_v25  ;;  %v1805_v61 = vsel %vm162_vm0, %v1782_v15, 0.0  ;;  %v1785_v5 = vmul.f32 %v5255_v0, %v5255_v0  ;;  %v1786_v19 = vmul.f32 %v5257_v48, %v5257_v48  ;;  %v3678_v15 = vld [vmem:[%s5889_s4] ss:$0 sm:$0xff] }
 0x298   :  { %v1807_v10 = vsel %vm162_vm0, %v1783_v23, 0.0  ;;  %v1809_v29 = vsel %vm162_vm0, %v1784_v55, 0.0  ;;  %v1787_v42 = vmul.f32 %v5259_v58, %v5259_v58  ;;  %v1788_v32 = vmul.f32 %v5261_v51, %v5261_v51 }
 0x299   :  { %v1796_v41 = vadd.f32 %v1795_v40, %v1794_v33  ;;  %v1811_v45 = vsel %vm162_vm0, %v1785_v5, 0.0  ;;  %v1813_v34 = vsel %vm162_vm0, %v1786_v19, 0.0  ;;  %v1789_v46 = vmul.f32 %v5263_v63, %v5263_v63 }
 0x29a   :  { %v1815_v56 = vsel %vm162_vm0, %v1787_v42, 0.0  ;;  %v1817_v9 = vsel %vm162_vm0, %v1788_v32, 0.0  ;;  %v1831_v24 = vlaneseq }
 0x29b   :  { %v1798_v4 = vadd.f32 %v1797_v44, %v1796_v41  ;;  %v1819_v22 = vsel %vm162_vm0, %v1789_v46, 0.0 }
 0x29c   :  { %v5313_v33 = vshrl.u32 %v1831_v24, 7 }
 0x29d   :  { %v1800_v12 = vadd.f32 %v1799_v11, %v1798_v4 }
 0x29e   :  { %5905 = vst [vmem:[#allocation3_spill] sm:$0xff] %v5313_v33  ;;  %v5896_v40 = vsub.s32 0, %v5313_v33 }
 0x29f   :  { %v1802_v20 = vadd.f32 %v1801_v18, %v1800_v12 }
 0x2a1   :  { %v1804_v52 = vadd.f32 %v1803_v30, %v1802_v20 }
 0x2a3   :  { %v1806_v3 = vadd.f32 %v1805_v61, %v1804_v52 }
 0x2a5   :  { %v1808_v13 = vadd.f32 %v1807_v10, %v1806_v3 }
 0x2a7   :  { %v1810_v39 = vadd.f32 %v1809_v29, %v1808_v13 }
 0x2a9   :  { %v1812_v21 = vadd.f32 %v1811_v45, %v1810_v39 }
 0x2ab   :  { %v1814_v38 = vadd.f32 %v1813_v34, %v1812_v21 }
 0x2ad   :  { %v1816_v62 = vadd.f32 %v1815_v56, %v1814_v38 }
 0x2af   :  { %v1818_v14 = vadd.f32 %v1817_v9, %v1816_v62 }
 0x2b1   :  { %v1820_v31 = vadd.f32 %v1819_v22, %v1818_v14 }
 0x2b3   :  { %v1821_v57 = vrot.slane %v1820_v31, 4 }
 0x2b5   :  { %v1822_v1 = vadd.f32 %v1821_v57, %v1820_v31 }
 0x2b7   :  { %v1823_v8 = vrot.slane %v1822_v1, 2 }
 0x2b9   :  { %v1824_v6 = vadd.f32 %v1823_v8, %v1822_v1  ;;  %v1930_v1 = vld [vmem:[#allocation2 + $0x1] sm:$0xff] }
 0x2bb   :  { %v1825_v16 = vrot.slane %v1824_v6, 1 }
 0x2bd   :  { %v1826_v17 = vadd.f32 %v1825_v16, %v1824_v6 }
 0x2bf   :  { %v1827_v25 = vmul.f32 0.0078125, %v1826_v17 }
 0x2c1   :  { %v1828_v26 = vadd.f32 1e-05, %v1827_v25 }
 0x2c3   :  { %4523 = vrsqrt.f32 %v1828_v26 }
 0x2cd   :  { %v4524_v41 = vpop.eup %4523 }
 0x2ce   :  { %v1830_v43 = vmul.f32 %v4524_v41, %v1718_v37 }
 0x2d0   :  { %v1834_v44 = vrot.slane %v1830_v43, %v5896_v40  ;;  %v2106_v43 = vsel %vm1980_vm5, %v5205_v2, 0 }
 0x2d2   :  { %v1835_v4 = vmul.f32 %v1834_v44, %v5230_v36  ;;  %v1836_v7 = vmul.f32 %v1834_v44, %v5233_v27  ;;  %v1837_v11 = vmul.f32 %v1834_v44, %v5236_v47  ;;  %v1838_v12 = vmul.f32 %v1834_v44, %v5239_v49 }
 0x2d3   :  { %v1839_v18 = vmul.f32 %v1834_v44, %v5241_v50  ;;  %v1840_v20 = vmul.f32 %v1834_v44, %v5243_v54  ;;  %v1841_v23 = vmul.f32 %v1834_v44, %v5245_v60  ;;  %v1842_v30 = vmul.f32 %v1834_v44, %v5247_v28 }
 0x2d4   :  { %v1843_v36 = vmul.f32 %v1834_v44, %v5249_v59  ;;  %v1844_v27 = vmul.f32 %v1834_v44, %v5251_v35  ;;  %v1845_v47 = vmul.f32 %v1834_v44, %v5253_v53  ;;  %v1846_v49 = vmul.f32 %v1834_v44, %v5255_v0 }
 0x2d5   :  { %v1847_v52 = vmul.f32 %v1834_v44, %v5257_v48  ;;  %v1848_v55 = vmul.f32 %v1834_v44, %v5259_v58  ;;  %v1849_v50 = vmul.f32 %v1834_v44, %v5261_v51  ;;  %v1850_v54 = vmul.f32 %v1834_v44, %v5263_v63 }
 0x2d6   :  { %v1857_v61 = vadd.f32 %v3678_v15, %v1835_v4  ;;  %v1858_v60 = vadd.f32 %v3678_v15, %v1836_v7  ;;  %v1859_v3 = vadd.f32 %v3678_v15, %v1837_v11  ;;  %v1860_v28 = vadd.f32 %v3678_v15, %v1838_v12  ;;  %v3696_v7 = vld [vmem:[%s5887_s5 + $0x8] sm:$0xf] }
 0x2d7   :  { %v1861_v5 = vadd.f32 %v3678_v15, %v1839_v18  ;;  %v1862_v59 = vadd.f32 %v3678_v15, %v1840_v20  ;;  %v1863_v10 = vadd.f32 %v3678_v15, %v1841_v23  ;;  %v1864_v35 = vadd.f32 %v3678_v15, %v1842_v30 }
 0x2d8   :  { %v1865_v13 = vadd.f32 %v3678_v15, %v1843_v36  ;;  %v1866_v53 = vadd.f32 %v3678_v15, %v1844_v27  ;;  %v1867_v19 = vadd.f32 %v3678_v15, %v1845_v47  ;;  %v1868_v0 = vadd.f32 %v3678_v15, %v1846_v49  ;;  %v1938_v49 = vld [vmem:[#allocation2 + $0xa1] sm:$0xff]  ;;  %v3714_v36 = vld [vmem:[%s5887_s5 + $0x10] sm:$0xf] }
 0x2d9   :  { %v1869_v29 = vadd.f32 %v3678_v15, %v1847_v52  ;;  %v1870_v48 = vadd.f32 %v3678_v15, %v1848_v55  ;;  %v1871_v39 = vadd.f32 %v3678_v15, %v1849_v50  ;;  %v1872_v58 = vadd.f32 %v3678_v15, %v1850_v54 }
 0x2da   :  { %v1873_v42 = vmax.f32 %v1857_v61, 0.0  ;;  %v1874_v51 = vmax.f32 %v1858_v60, 0.0  ;;  %v1875_v45 = vmax.f32 %v1859_v3, 0.0  ;;  %v1876_v63 = vmax.f32 %v1860_v28, 0.0 }
 0x2db   :  { %v1877_v21 = vmax.f32 %v1861_v5, 0.0  ;;  %v1878_v32 = vmax.f32 %v1862_v59, 0.0  ;;  %v1879_v34 = vmax.f32 %v1863_v10, 0.0  ;;  %v1880_v38 = vmax.f32 %v1864_v35, 0.0 }
 0x2dc   :  { %v1881_v46 = vmax.f32 %v1865_v13, 0.0  ;;  %v1882_v56 = vmax.f32 %v1866_v53, 0.0  ;;  %v1883_v62 = vmax.f32 %v1867_v19, 0.0  ;;  %v1884_v9 = vmax.f32 %v1868_v0, 0.0  ;;  %1889 = vst.msk [vmem:[#allocation2 + $0x11] sm:$0xff] %vm162_vm0, %v1873_v42  ;;  %1890 = vst.msk [vmem:[#allocation2 + $0x21] sm:$0xff] %vm162_vm0, %v1874_v51 }
 0x2dd   :  { %1891 = vst.msk [vmem:[#allocation2 + $0x31] sm:$0xff] %vm162_vm0, %v1875_v45  ;;  %1892 = vst.msk [vmem:[#allocation2 + $0x41] sm:$0xff] %vm162_vm0, %v1876_v63  ;;  %v1885_v14 = vmax.f32 %v1869_v29, 0.0  ;;  %v1886_v22 = vmax.f32 %v1870_v48, 0.0  ;;  %v1887_v31 = vmax.f32 %v1871_v39, 0.0  ;;  %v1888_v57 = vmax.f32 %v1872_v58, 0.0 }
 0x2de   :  { %1893 = vst.msk [vmem:[#allocation2 + $0x51] sm:$0xff] %vm162_vm0, %v1877_v21  ;;  %1894 = vst.msk [vmem:[#allocation2 + $0x61] sm:$0xff] %vm162_vm0, %v1878_v32  ;;  %v1905_v63 = vld [vmem:[#allocation2] sm:$0xff]  ;;  %v2588_v33 = vsel %vm1980_vm5, %v3714_v36, 0 }
 0x2df   :  { %1895 = vst.msk [vmem:[#allocation2 + $0x71] sm:$0xff] %vm162_vm0, %v1879_v34  ;;  %1896 = vst.msk [vmem:[#allocation2 + $0x81] sm:$0xff] %vm162_vm0, %v1880_v38  ;;  %v2205_v48 = vld [vmem:[#allocation2 + $0x2] sm:$0xff] }
 0x2e0   :  { %1897 = vst.msk [vmem:[#allocation2 + $0xb1] sm:$0xff] %vm162_vm0, %v1881_v46  ;;  %1898 = vst.msk [vmem:[#allocation2 + $0xc1] sm:$0xff] %vm162_vm0, %v1882_v56 }
 0x2e1   :  { %1899 = vst.msk [vmem:[#allocation2 + $0xd1] sm:$0xff] %vm162_vm0, %v1883_v62  ;;  %1900 = vst.msk [vmem:[#allocation2 + $0xe1] sm:$0xff] %vm162_vm0, %v1884_v9 }
 0x2e2   :  { %1901 = vst.msk [vmem:[#allocation2 + $0xf1] sm:$0xff] %vm162_vm0, %v1885_v14  ;;  %1902 = vst.msk [vmem:[#allocation2 + $0x101] sm:$0xff] %vm162_vm0, %v1886_v22  ;;  %v2256_v14 = vsel %vm1980_vm5, %v3696_v7, 0 }
 0x2e3   :  { %1903 = vst.msk [vmem:[#allocation2 + $0x111] sm:$0xff] %vm162_vm0, %v1887_v31  ;;  %1904 = vst.msk [vmem:[#allocation2 + $0x121] sm:$0xff] %vm162_vm0, %v1888_v57  ;;  %v5356_v8 = vld [vmem:[#allocation2 + $0x11] sm:$0xff]  ;;  %v5358_v6 = vld [vmem:[#allocation2 + $0x21] sm:$0xff] }
 0x2e4   :  { %v5360_v16 = vld [vmem:[#allocation2 + $0x31] sm:$0xff]  ;;  %v1946_v17 = vpack.c.bf16 %v5356_v8, %v1930_v1  ;;  %v5367_v26 = vld [vmem:[#allocation2 + $0x41] sm:$0xff]  ;;  %v3705_v31 = vld [vmem:[%s5887_s5 + $0xc] sm:$0xf] }
 0x2e5   :  { %v5365_v25 = vpack.c.bf16 %v5360_v16, %v5358_v6  ;;  %v5369_v24 = vld [vmem:[#allocation2 + $0x51] sm:$0xff]  ;;  %v5371_v37 = vld [vmem:[#allocation2 + $0x61] sm:$0xff]  ;;  %v2422_v3 = vsel %vm1980_vm5, %v3705_v31, 0 }
 0x2e6   :  { %4087 = vmatprep.mubr.msk.bf16.mxu1 %vm162_vm0, %v1946_v17  ;;  %v5391_v15 = vpack.c.bf16 %v5369_v24, %v5367_v26  ;;  %v5412_v47 = vld [vmem:[#allocation2 + $0x71] sm:$0xff]  ;;  %v5416_v55 = vld [vmem:[#allocation2 + $0x22] sm:$0xff] }
 0x2e7   :  { %v5377_v44 = vld [vmem:[#allocation2 + $0xb1] sm:$0xff]  ;;  %v5379_v4 = vld [vmem:[#allocation2 + $0xc1] sm:$0xff]  ;;  %4088 = vmatmul.mubr.msk.bf16.vlgmr.msra.gmra.mrb[0].mxu1 %vm162_vm0, %v5365_v25  ;;  %v5420_v50 = vpack.c.bf16 %v5412_v47, %v5371_v37 }
 0x2e8   :  { %v5393_v2 = vld [vmem:[#allocation2 + $0xd1] sm:$0xff]  ;;  %v5395_v18 = vld [vmem:[#allocation2 + $0xe1] sm:$0xff]  ;;  %4104 = vmatpush3.bf16.msra.mxu1 %v2106_v43  ;;  %4091 = vmatprep.mubr.msk.bf16.mxu1 %vm162_vm0, %v5391_v15  ;;  %v1950_v28 = vpack.c.bf16 %v5377_v44, %v1938_v49 }
 0x2e9   :  { %v5397_v20 = vld [vmem:[#allocation2 + $0xf1] sm:$0xff]  ;;  %v5403_v30 = vld [vmem:[#allocation2 + $0x101] sm:$0xff]  ;;  %4514 = vmatprep.subr.msk.bf16.mxu1 %vm1980_vm5, %v3696_v7  ;;  %v5460_v42 = vpack.c.bf16 %v5393_v2, %v5379_v4 }
 0x2ea   :  { %v5414_v52 = vld [vmem:[#allocation2 + $0x12] sm:$0xff]  ;;  %v5424_v61 = vld [vmem:[#allocation2 + $0x42] sm:$0xff]  ;;  %v5464_v51 = vpack.c.bf16 %v5397_v20, %v5395_v18 }
 0x2eb   :  { %v5422_v54 = vld [vmem:[#allocation2 + $0x32] sm:$0xff]  ;;  %v5431_v5 = vld [vmem:[#allocation2 + $0x62] sm:$0xff] }
 0x2ec   :  { %v5426_v60 = vld [vmem:[#allocation2 + $0x52] sm:$0xff]  ;;  %v5439_v35 = vld [vmem:[#allocation2 + $0xc2] sm:$0xff]  ;;  %v5516_v10 = vpack.c.bf16 %v5422_v54, %v5416_v55 }
 0x2ed   :  { %v5433_v59 = vld [vmem:[#allocation2 + $0xb2] sm:$0xff]  ;;  %v5443_v53 = vld [vmem:[#allocation2 + $0xe2] sm:$0xff]  ;;  %v5521_v27 = vpack.c.bf16 %v5426_v60, %v5424_v61 }
 0x2ee   :  { %v5441_v13 = vld [vmem:[#allocation2 + $0xd2] sm:$0xff]  ;;  %v5450_v29 = vld [vmem:[#allocation2 + $0x102] sm:$0xff] }
 0x2ef   :  { %4092 = vmatmul.mubr.msk.bf16.gmra.mrb[4].mxu1 %vm162_vm0, %v5420_v50  ;;  %v5448_v0 = vld [vmem:[#allocation2 + $0xf2] sm:$0xff]  ;;  %v1907_v38 = vld [vmem:[#allocation2 + $0x20] sm:$0xff] }
 0x2f0   :  { %4095 = vmatprep.mubr.msk.bf16.mxu1 %vm162_vm0, %v1950_v28  ;;  %v5470_v45 = vld [vmem:[#allocation2 + $0x111] sm:$0xff]  ;;  %v1909_v56 = vld [vmem:[#allocation2 + $0x40] sm:$0xff]  ;;  %v5544_v12 = vpack.c.bf16 %v5448_v0, %v5443_v53 }
 0x2f1   :  { %v5472_v21 = vld [vmem:[#allocation2 + $0x10] sm:$0xff]  ;;  %v5476_v32 = vpack.c.bf16 %v5470_v45, %v5403_v30  ;;  %v1911_v57 = vld [vmem:[#allocation2 + $0x60] sm:$0xff] }
 0x2f2   :  { %v1921_v34 = vpack.c.bf16 %v5472_v21, %v1905_v63  ;;  %v1908_v46 = vld [vmem:[#allocation2 + $0x30] sm:$0xff]  ;;  %v1913_v17 = vld [vmem:[#allocation2 + $0xa0] sm:$0xff] }
 0x2f3   :  { %v1910_v62 = vld [vmem:[#allocation2 + $0x50] sm:$0xff]  ;;  %v5482_v9 = vpack.c.bf16 %v1908_v46, %v1907_v38  ;;  %v1915_v28 = vld [vmem:[#allocation2 + $0xc0] sm:$0xff]  ;;  %v2388_v41 = vpack.c.bf16 %v1909_v56, %v1908_v46 }
 0x2f4   :  { %v5485_v22 = vpack.c.bf16 %v1910_v62, %v1909_v56  ;;  %v1912_v1 = vld [vmem:[#allocation2 + $0x70] sm:$0xff]  ;;  %v2386_v56 = vld [vmem:[#allocation2 + $0x120] sm:$0xff] }
 0x2f5   :  { %v1914_v43 = vld [vmem:[#allocation2 + $0xb0] sm:$0xff]  ;;  %v5495_v7 = vpack.c.bf16 %v1912_v1, %v1911_v57 }
 0x2f6   :  { %v1925_v49 = vpack.c.bf16 %v1914_v43, %v1913_v17  ;;  %v1916_v63 = vld [vmem:[#allocation2 + $0xd0] sm:$0xff]  ;;  %v1919_v17 = vld [vmem:[#allocation2 + $0x100] sm:$0xff] }
 0x2f7   :  { %4096 = vmatmul.mubr.msk.bf16.gmra.mrb[8].mxu1 %vm162_vm0, %v5460_v42  ;;  %v5500_v40 = vpack.c.bf16 %v1916_v63, %v1915_v28  ;;  %v1920_v39 = vld [vmem:[#allocation2 + $0x110] sm:$0xff] }
 0x2f8   :  { %4099 = vmatprep.mubr.msk.bf16.mxu1 %vm162_vm0, %v5464_v51  ;;  %v5508_v19 = vpack.c.bf16 %v1920_v39, %v1919_v17 }
 0x2ff   :  { %4100 = vmatmul.mubr.msk.bf16.gmra.mrb[12].mxu1 %vm162_vm0, %v5476_v32 }
 0x300   :  { %4105 = vmatprep.mubr.msk.bf16.mxu1 %vm162_vm0, %v1921_v34  ;;  %v1917_v34 = vld [vmem:[#allocation2 + $0xe0] sm:$0xff] }
 0x307   :  { %4106 = vmatmul.mubr.msk.bf16.vlgmr.msra.gmra.mrb[0].mxu1 %vm162_vm0, %v5482_v9 }
 0x308   :  { %4122 = vmatpush3.bf16.msra.mxu1 %v2256_v14  ;;  %4109 = vmatprep.mubr.msk.bf16.mxu1 %vm162_vm0, %v5485_v22  ;;  %v1918_v14 = vld [vmem:[#allocation2 + $0xf0] sm:$0xff] }
 0x309   :  { %4515 = vmatprep.subr.msk.bf16.mxu1 %vm1980_vm5, %v3705_v31  ;;  %v5502_v58 = vpack.c.bf16 %v1918_v14, %v1917_v34  ;;  %v2393_v46 = vpack.c.bf16 %v1919_v17, %v1918_v14 }
 0x30f   :  { %4110 = vmatmul.mubr.msk.bf16.gmra.mrb[4].mxu1 %vm162_vm0, %v5495_v7 }
 0x310   :  { %4113 = vmatprep.mubr.msk.bf16.mxu1 %vm162_vm0, %v1925_v49  ;;  %v2221_v49 = vpack.c.bf16 %v5414_v52, %v2205_v48  ;;  %v2212_v48 = vld [vmem:[#allocation2 + $0x72] sm:$0xff] }
 0x311   :  { %v5532_v31 = vpack.c.bf16 %v2212_v48, %v5431_v5 }
 0x313   :  { %5906 = vst [vmem:[#allocation4_spill] sm:$0xff] %v5532_v31 }
 0x317   :  { %4114 = vmatmul.mubr.msk.bf16.gmra.mrb[8].mxu1 %vm162_vm0, %v5500_v40 }
 0x318   :  { %4117 = vmatprep.mubr.msk.bf16.mxu1 %vm162_vm0, %v5502_v58 }
 0x31f   :  { %4118 = vmatmul.mubr.msk.bf16.gmra.mrb[12].mxu1 %vm162_vm0, %v5508_v19 }
 0x320   :  { %4123 = vmatprep.mubr.msk.bf16.mxu1 %vm162_vm0, %v2221_v49  ;;  %v2213_v49 = vld [vmem:[#allocation2 + $0xa2] sm:$0xff] }
 0x321   :  { %v2225_v23 = vpack.c.bf16 %v5433_v59, %v2213_v49  ;;  %v2220_v49 = vld [vmem:[#allocation2 + $0x112] sm:$0xff] }
 0x322   :  { %v5551_v11 = vpack.c.bf16 %v2220_v49, %v5450_v29 }
 0x324   :  { %5908 = vst [vmem:[#allocation6_spill] sm:$0xff] %v5551_v11 }
 0x327   :  { %4124 = vmatmul.mubr.msk.bf16.vlgmr.msra.gmra.mrb[0].mxu1 %vm162_vm0, %v5516_v10 }
 0x328   :  { %4140 = vmatpush3.bf16.msra.mxu1 %v2422_v3  ;;  %4127 = vmatprep.mubr.msk.bf16.mxu1 %vm162_vm0, %v5521_v27  ;;  %v5540_v3 = vpack.c.bf16 %v5441_v13, %v5439_v35 }
 0x329   :  { %4516 = vmatprep.subr.msk.bf16.mxu1 %vm1980_vm5, %v3714_v36  ;;  %v2392_v36 = vpack.c.bf16 %v1917_v34, %v1916_v63 }
 0x32a   :  { %5907 = vst [vmem:[#allocation5_spill] sm:$0xff] %v5540_v3 }
 0x32f   :  { %4128 = vmatmul.mubr.msk.bf16.gmra.mrb[4].mxu1 %vm162_vm0, %v5532_v31  ;;  %v2389_v31 = vpack.c.bf16 %v1911_v57, %v1910_v62  ;;  %v5910_v57 = vpack.c.bf16 %v5367_v26, %v5360_v16  ;;  %v5913_v16 = vpack.c.bf16 %v5395_v18, %v5393_v2  ;;  %v5914_v26 = vpack.c.bf16 %v5403_v30, %v5397_v20  ;;  %v3741_v2 = vld [vmem:[%s5887_s5 + $0x1c] sm:$0xf]  ;;  %v2710_v30 = vld [vmem:[#allocation2 + $0x82] sm:$0xff] }
 0x330   :  { %4131 = vmatprep.mubr.msk.bf16.mxu1 %vm162_vm0, %v2225_v23  ;;  %v2387_v23 = vpack.c.bf16 %v1907_v38, %v5472_v21  ;;  %v2378_v21 = vld [vmem:[#allocation2 + $0x80] sm:$0xff]  ;;  %v5916_v18 = vpack.c.bf16 %v5424_v61, %v5422_v54  ;;  %v5917_v20 = vpack.c.bf16 %v5431_v5, %v5426_v60  ;;  %v5920_v54 = vpack.c.bf16 %v5450_v29, %v5448_v0 }
 0x331   :  { %v2390_v38 = vpack.c.bf16 %v2378_v21, %v1912_v1  ;;  %v5912_v1 = vpack.c.bf16 %v5379_v4, %v5377_v44  ;;  %v5915_v44 = vpack.c.bf16 %v5416_v55, %v5414_v52  ;;  %v5918_v52 = vpack.c.bf16 %v5439_v35, %v5433_v59  ;;  %v2718_v61 = vld [vmem:[#allocation2 + $0x122] sm:$0xff]  ;;  %v2876_v35 = vld [vmem:[#allocation2 + $0x90] sm:$0xff] }
 0x332   :  { %v5919_v55 = vpack.c.bf16 %v5443_v53, %v5441_v13  ;;  %v2726_v60 = vpack.c.bf16 %v2718_v61, %v2220_v49  ;;  %v3086_v5 = vsel %vm1980_vm5, %v3741_v2, 0  ;;  %v3750_v59 = vld [vmem:[%s5887_s5 + $0x20] sm:$0xf]  ;;  %v2888_v13 = vpack.c.bf16 %v2876_v35, %v2378_v21  ;;  %v2884_v53 = vld [vmem:[#allocation2 + $0x130] sm:$0xff] }
 0x333   :  { %v2892_v0 = vpack.c.bf16 %v2884_v53, %v2386_v56  ;;  %v3252_v29 = vsel %vm1980_vm5, %v3750_v59, 0 }
 0x337   :  { %4132 = vmatmul.mubr.msk.bf16.gmra.mrb[8].mxu1 %vm162_vm0, %v5540_v3  ;;  %v3723_v3 = vld [vmem:[%s5887_s5 + $0x14] sm:$0xf] }
 0x338   :  { %4135 = vmatprep.mubr.msk.bf16.mxu1 %vm162_vm0, %v5544_v12  ;;  %v2754_v62 = vsel %vm1980_vm5, %v3723_v3, 0 }
 0x33f   :  { %4136 = vmatmul.mubr.msk.bf16.gmra.mrb[12].mxu1 %vm162_vm0, %v5551_v11  ;;  %v2391_v11 = vpack.c.bf16 %v1915_v28, %v1914_v43 }
 0x340   :  { %4141 = vmatprep.mubr.msk.bf16.mxu1 %vm162_vm0, %v2387_v23 }
 0x347   :  { %4142 = vmatmul.mubr.msk.bf16.vlgmr.msra.gmra.mrb[0].mxu1 %vm162_vm0, %v2388_v41  ;;  %v2394_v41 = vpack.c.bf16 %v2386_v56, %v1920_v39  ;;  %v5911_v39 = vpack.c.bf16 %v5371_v37, %v5369_v24  ;;  %v2552_v24 = vld [vmem:[#allocation2 + $0x121] sm:$0xff] }
 0x348   :  { %4158 = vmatpush3.bf16.msra.mxu1 %v2588_v33  ;;  %4145 = vmatprep.mubr.msk.bf16.mxu1 %vm162_vm0, %v2389_v31  ;;  %v5909_v33 = vpack.c.bf16 %v5358_v6, %v5356_v8  ;;  %v2544_v8 = vld [vmem:[#allocation2 + $0x81] sm:$0xff]  ;;  %v2560_v37 = vpack.c.bf16 %v2552_v24, %v5470_v45  ;;  %v5923_v45 = vld [vmem:[#allocation6_spill] sm:$0xff] }
 0x349   :  { %4517 = vmatprep.subr.msk.bf16.mxu1 %vm1980_vm5, %v3723_v3  ;;  %v2556_v6 = vpack.c.bf16 %v2544_v8, %v5412_v47  ;;  %v2722_v47 = vpack.c.bf16 %v2710_v30, %v2212_v48 }
 0x34f   :  { %4146 = vmatmul.mubr.msk.bf16.gmra.mrb[4].mxu1 %vm162_vm0, %v2390_v38 }
 0x350   :  { %4149 = vmatprep.mubr.msk.bf16.mxu1 %vm162_vm0, %v2391_v11  ;;  %v3732_v11 = vld [vmem:[%s5887_s5 + $0x18] sm:$0xf] }
 0x351   :  { %v2920_v4 = vsel %vm1980_vm5, %v3732_v11, 0 }
 0x357   :  { %4150 = vmatmul.mubr.msk.bf16.gmra.mrb[8].mxu1 %vm162_vm0, %v2392_v36 }
 0x358   :  { %4153 = vmatprep.mubr.msk.bf16.mxu1 %vm162_vm0, %v2393_v46 }
 0x35f   :  { %4154 = vmatmul.mubr.msk.bf16.gmra.mrb[12].mxu1 %vm162_vm0, %v2394_v41 }
 0x360   :  { %4159 = vmatprep.mubr.msk.bf16.mxu1 %vm162_vm0, %v5909_v33 }
 0x367   :  { %4160 = vmatmul.mubr.msk.bf16.vlgmr.msra.gmra.mrb[0].mxu1 %vm162_vm0, %v5910_v57 }
 0x368   :  { %4176 = vmatpush3.bf16.msra.mxu1 %v2754_v62  ;;  %4163 = vmatprep.mubr.msk.bf16.mxu1 %vm162_vm0, %v5911_v39 }
 0x369   :  { %4518 = vmatprep.subr.msk.bf16.mxu1 %vm1980_vm5, %v3732_v11 }
 0x36f   :  { %4164 = vmatmul.mubr.msk.bf16.gmra.mrb[4].mxu1 %vm162_vm0, %v2556_v6 }
 0x370   :  { %4167 = vmatprep.mubr.msk.bf16.mxu1 %vm162_vm0, %v5912_v1 }
 0x377   :  { %4168 = vmatmul.mubr.msk.bf16.gmra.mrb[8].mxu1 %vm162_vm0, %v5913_v16 }
 0x378   :  { %4171 = vmatprep.mubr.msk.bf16.mxu1 %vm162_vm0, %v5914_v26 }
 0x37f   :  { %4172 = vmatmul.mubr.msk.bf16.gmra.mrb[12].mxu1 %vm162_vm0, %v2560_v37 }
 0x380   :  { %4177 = vmatprep.mubr.msk.bf16.mxu1 %vm162_vm0, %v5915_v44 }
 0x387   :  { %4178 = vmatmul.mubr.msk.bf16.vlgmr.msra.gmra.mrb[0].mxu1 %vm162_vm0, %v5916_v18 }
 0x388   :  { %4194 = vmatpush3.bf16.msra.mxu1 %v2920_v4  ;;  %4181 = vmatprep.mubr.msk.bf16.mxu1 %vm162_vm0, %v5917_v20 }
 0x389   :  { %4519 = vmatprep.subr.msk.bf16.mxu1 %vm1980_vm5, %v3741_v2 }
 0x38f   :  { %4182 = vmatmul.mubr.msk.bf16.gmra.mrb[4].mxu1 %vm162_vm0, %v2722_v47 }
 0x390   :  { %4185 = vmatprep.mubr.msk.bf16.mxu1 %vm162_vm0, %v5918_v52 }
 0x397   :  { %4186 = vmatmul.mubr.msk.bf16.gmra.mrb[8].mxu1 %vm162_vm0, %v5919_v55 }
 0x398   :  { %4189 = vmatprep.mubr.msk.bf16.mxu1 %vm162_vm0, %v5920_v54 }
 0x39f   :  { %4190 = vmatmul.mubr.msk.bf16.gmra.mrb[12].mxu1 %vm162_vm0, %v2726_v60 }
 0x3a0   :  { %4195 = vmatprep.mubr.msk.bf16.mxu1 %vm162_vm0, %v5482_v9 }
 0x3a7   :  { %4196 = vmatmul.mubr.msk.bf16.vlgmr.msra.gmra.mrb[0].mxu1 %vm162_vm0, %v5485_v22 }
 0x3a8   :  { %4212 = vmatpush3.bf16.msra.mxu1 %v3086_v5  ;;  %4199 = vmatprep.mubr.msk.bf16.mxu1 %vm162_vm0, %v5495_v7 }
 0x3a9   :  { %4520 = vmatprep.subr.msk.bf16.mxu1 %vm1980_vm5, %v3750_v59 }
 0x3af   :  { %4200 = vmatmul.mubr.msk.bf16.gmra.mrb[4].mxu1 %vm162_vm0, %v2888_v13 }
 0x3b0   :  { %4203 = vmatprep.mubr.msk.bf16.mxu1 %vm162_vm0, %v5500_v40  ;;  %v3042_v40 = vld [vmem:[#allocation2 + $0x91] sm:$0xff] }
 0x3b7   :  { %4204 = vmatmul.mubr.msk.bf16.gmra.mrb[8].mxu1 %vm162_vm0, %v5502_v58  ;;  %v3054_v58 = vpack.c.bf16 %v3042_v40, %v2544_v8 }
 0x3b8   :  { %4207 = vmatprep.mubr.msk.bf16.mxu1 %vm162_vm0, %v5508_v19 }
 0x3bf   :  { %4208 = vmatmul.mubr.msk.bf16.gmra.mrb[12].mxu1 %vm162_vm0, %v2892_v0 }
 0x3c0   :  { %4213 = vmatprep.mubr.msk.bf16.mxu1 %vm162_vm0, %v5365_v25  ;;  %v3050_v25 = vld [vmem:[#allocation2 + $0x131] sm:$0xff] }
 0x3c1   :  { %v3058_v19 = vpack.c.bf16 %v3050_v25, %v2552_v24 }
 0x3c7   :  { %4214 = vmatmul.mubr.msk.bf16.vlgmr.msra.gmra.mrb[0].mxu1 %vm162_vm0, %v5391_v15  ;;  %v5921_v15 = vld [vmem:[#allocation4_spill] sm:$0xff] }
 0x3c8   :  { %4230 = vmatpush3.bf16.msra.mxu1 %v3252_v29  ;;  %4217 = vmatprep.mubr.msk.bf16.mxu1 %vm162_vm0, %v5420_v50  ;;  %v3208_v50 = vld [vmem:[#allocation2 + $0x92] sm:$0xff] }
 0x3cf   :  { %4218 = vmatmul.mubr.msk.bf16.gmra.mrb[4].mxu1 %vm162_vm0, %v3054_v58 }
 0x3d0   :  { %4221 = vmatprep.mubr.msk.bf16.mxu1 %vm162_vm0, %v5460_v42  ;;  %v3220_v42 = vpack.c.bf16 %v3208_v50, %v2710_v30 }
 0x3d7   :  { %4222 = vmatmul.mubr.msk.bf16.gmra.mrb[8].mxu1 %vm162_vm0, %v5464_v51  ;;  %v5922_v51 = vld [vmem:[#allocation5_spill] sm:$0xff] }
 0x3d8   :  { %4225 = vmatprep.mubr.msk.bf16.mxu1 %vm162_vm0, %v5476_v32 }
 0x3df   :  { %4226 = vmatmul.mubr.msk.bf16.gmra.mrb[12].mxu1 %vm162_vm0, %v3058_v19 }
 0x3e0   :  { %4231 = vmatprep.mubr.msk.bf16.mxu1 %vm162_vm0, %v5516_v10  ;;  %v3216_v10 = vld [vmem:[#allocation2 + $0x132] sm:$0xff] }
 0x3e1   :  { %v3224_v32 = vpack.c.bf16 %v3216_v10, %v2718_v61 }
 0x3e7   :  { %4232 = vmatmul.mubr.msk.bf16.vlgmr.msra.gmra.mrb[0].mxu1 %vm162_vm0, %v5521_v27  ;;  %v3759_v27 = vld [vmem:[%s5890_s6] ss:$0 sm:$0xff] }
 0x3e8   :  { %4235 = vmatprep.mubr.msk.bf16.mxu1 %vm162_vm0, %v5921_v15 }
 0x3ef   :  { %4236 = vmatmul.mubr.msk.bf16.gmra.mrb[4].mxu1 %vm162_vm0, %v3220_v42 }
 0x3f0   :  { %4239 = vmatprep.mubr.msk.bf16.mxu1 %vm162_vm0, %v5922_v51 }
 0x3f7   :  { %4240 = vmatmul.mubr.msk.bf16.gmra.mrb[8].mxu1 %vm162_vm0, %v5544_v12 }
 0x3f8   :  { %4243 = vmatprep.mubr.msk.bf16.mxu1 %vm162_vm0, %v5923_v45 }
 0x3ff   :  { %4244 = vmatmul.mubr.msk.bf16.gmra.mrb[12].mxu1 %vm162_vm0, %v3224_v32 }
 0x4ba   :  { %v4233_v9 = vpop.f32.mrb[0].mxu1 }
 0x4bb   :  { %v3288_v22 = vpop.f32.mrb[1].mxu1  ;;  %v5686_v63 = vadd.f32 %v4233_v9, %v3759_v27 }
 0x4bc   :  { %v5684_v43 = vadd.f32 %v3759_v27, %v3288_v22  ;;  %v4234_v7 = vpop.f32.mrb[2].mxu1 }
 0x4bd   :  { %v3291_v28 = vpop.f32.mrb[3].mxu1  ;;  %v5692_v14 = vadd.f32 %v4234_v7, %v3759_v27  ;;  %v3395_v31 = vsel %vm162_vm0, %v5686_v63, 0.0 }
 0x4be   :  { %v5688_v12 = vadd.f32 %v3759_v27, %v3291_v28  ;;  %v3392_v34 = vsel %vm162_vm0, %v5684_v43, 0.0 }
 0x4bf   :  { %v3397_v21 = vsel %vm162_vm0, %v5692_v14, 0.0 }
 0x4c0   :  { %v3393_v17 = vsel %vm162_vm0, %v5688_v12, 0.0 }
 0x4c1   :  { %v3394_v48 = vadd.f32 %v3393_v17, %v3392_v34 }
 0x4c2   :  { %v4237_v3 = vpop.f32.mrb[4].mxu1 }
 0x4c3   :  { %v3396_v49 = vadd.f32 %v3395_v31, %v3394_v48  ;;  %v3304_v23 = vpop.f32.mrb[5].mxu1  ;;  %v3380_v41 = vadd.f32 %v4237_v3, %v3759_v27 }
 0x4c4   :  { %v3378_v38 = vadd.f32 %v3759_v27, %v3304_v23  ;;  %v4238_v36 = vpop.f32.mrb[6].mxu1 }
 0x4c5   :  { %v3398_v46 = vadd.f32 %v3397_v21, %v3396_v49  ;;  %v3307_v56 = vpop.f32.mrb[7].mxu1  ;;  %v3381_v57 = vadd.f32 %v4238_v36, %v3759_v27  ;;  %v3403_v6 = vsel %vm162_vm0, %v3380_v41, 0.0 }
 0x4c6   :  { %v3399_v33 = vsel %vm162_vm0, %v3378_v38, 0.0  ;;  %v3379_v62 = vadd.f32 %v3759_v27, %v3307_v56 }
 0x4c7   :  { %v3400_v11 = vadd.f32 %v3399_v33, %v3398_v46  ;;  %v3405_v24 = vsel %vm162_vm0, %v3381_v57, 0.0 }
 0x4c8   :  { %v3401_v39 = vsel %vm162_vm0, %v3379_v62, 0.0 }
 0x4c9   :  { %v3402_v8 = vadd.f32 %v3401_v39, %v3400_v11 }
 0x4ca   :  { %v4241_v1 = vpop.f32.mrb[8].mxu1 }
 0x4cb   :  { %v3404_v16 = vadd.f32 %v3403_v6, %v3402_v8  ;;  %v3320_v26 = vpop.f32.mrb[9].mxu1  ;;  %v3384_v18 = vadd.f32 %v4241_v1, %v3759_v27 }
 0x4cc   :  { %v3382_v37 = vadd.f32 %v3759_v27, %v3320_v26  ;;  %v4242_v44 = vpop.f32.mrb[10].mxu1 }
 0x4cd   :  { %v3406_v4 = vadd.f32 %v3405_v24, %v3404_v16  ;;  %v3323_v2 = vpop.f32.mrb[11].mxu1  ;;  %v3385_v52 = vadd.f32 %v4242_v44, %v3759_v27  ;;  %v3411_v61 = vsel %vm162_vm0, %v3384_v18, 0.0 }
 0x4ce   :  { %v3407_v20 = vsel %vm162_vm0, %v3382_v37, 0.0  ;;  %v3383_v30 = vadd.f32 %v3759_v27, %v3323_v2 }
 0x4cf   :  { %v3408_v47 = vadd.f32 %v3407_v20, %v3406_v4  ;;  %v3413_v35 = vsel %vm162_vm0, %v3385_v52, 0.0 }
 0x4d0   :  { %v3409_v55 = vsel %vm162_vm0, %v3383_v30, 0.0 }
 0x4d1   :  { %v3410_v54 = vadd.f32 %v3409_v55, %v3408_v47 }
 0x4d2   :  { %v4245_v60 = vpop.f32.mrb[12].mxu1 }
 0x4d3   :  { %v3412_v5 = vadd.f32 %v3411_v61, %v3410_v54  ;;  %v3336_v59 = vpop.f32.mrb[13].mxu1  ;;  %v3388_v40 = vadd.f32 %v4245_v60, %v3759_v27 }
 0x4d4   :  { %v3386_v13 = vadd.f32 %v3759_v27, %v3336_v59  ;;  %v4246_v53 = vpop.f32.mrb[14].mxu1 }
 0x4d5   :  { %v3414_v0 = vadd.f32 %v3413_v35, %v3412_v5  ;;  %v3339_v29 = vpop.f32.mrb[15].mxu1  ;;  %v3389_v15 = vadd.f32 %v4246_v53, %v3759_v27  ;;  %v3419_v51 = vsel %vm162_vm0, %v3388_v40, 0.0 }
 0x4d6   :  { %v3415_v58 = vsel %vm162_vm0, %v3386_v13, 0.0  ;;  %v3387_v25 = vadd.f32 %v3759_v27, %v3339_v29 }
 0x4d7   :  { %v3416_v19 = vadd.f32 %v3415_v58, %v3414_v0  ;;  %v3421_v10 = vsel %vm162_vm0, %v3389_v15, 0.0 }
 0x4d8   :  { %v3417_v50 = vsel %vm162_vm0, %v3387_v25, 0.0 }
 0x4d9   :  { %v3418_v42 = vadd.f32 %v3417_v50, %v3416_v19 }
 0x4db   :  { %v3420_v45 = vadd.f32 %v3419_v51, %v3418_v42 }
 0x4dd   :  { %v3422_v32 = vadd.f32 %v3421_v10, %v3420_v45 }
 0x4df   :  { %v3423_v9 = vrot.slane %v3422_v32, 4 }
 0x4e1   :  { %v3424_v22 = vadd.f32 %v3423_v9, %v3422_v32 }
 0x4e3   :  { %v3425_v7 = vrot.slane %v3424_v22, 2 }
 0x4e5   :  { %v3426_v28 = vadd.f32 %v3425_v7, %v3424_v22 }
 0x4e7   :  { %v3427_v34 = vrot.slane %v3426_v28, 1 }
 0x4e9   :  { %v3428_v17 = vadd.f32 %v3427_v34, %v3426_v28 }
 0x4eb   :  { %v3429_v48 = vmul.f32 0.0078125, %v3428_v17 }
 0x4ed   :  { %v5713_v31 = vsub.f32 %v5684_v43, %v3429_v48  ;;  %v5716_v27 = vsub.f32 %v5688_v12, %v3429_v48  ;;  %v5719_v3 = vsub.f32 %v5686_v63, %v3429_v48  ;;  %v5722_v49 = vsub.f32 %v5692_v14, %v3429_v48 }
 0x4ee   :  { %v5724_v23 = vsub.f32 %v3378_v38, %v3429_v48  ;;  %v5726_v21 = vsub.f32 %v3379_v62, %v3429_v48  ;;  %v5728_v36 = vsub.f32 %v3380_v41, %v3429_v48  ;;  %v5730_v46 = vsub.f32 %v3381_v57, %v3429_v48 }
 0x4ef   :  { %v5732_v56 = vsub.f32 %v3382_v37, %v3429_v48  ;;  %v5734_v43 = vsub.f32 %v3383_v30, %v3429_v48  ;;  %v5736_v12 = vsub.f32 %v3384_v18, %v3429_v48  ;;  %v5738_v33 = vsub.f32 %v3385_v52, %v3429_v48 }
 0x4f0   :  { %v5740_v63 = vsub.f32 %v3386_v13, %v3429_v48  ;;  %v5742_v14 = vsub.f32 %v3387_v25, %v3429_v48  ;;  %v5744_v38 = vsub.f32 %v3388_v40, %v3429_v48  ;;  %v5746_v62 = vsub.f32 %v3389_v15, %v3429_v48 }
 0x4f1   :  { %v3446_v41 = vmul.f32 %v5713_v31, %v5713_v31  ;;  %v3447_v11 = vmul.f32 %v5716_v27, %v5716_v27  ;;  %v3448_v57 = vmul.f32 %v5719_v3, %v5719_v3  ;;  %v3449_v39 = vmul.f32 %v5722_v49, %v5722_v49 }
 0x4f2   :  { %v3450_v16 = vmul.f32 %v5724_v23, %v5724_v23  ;;  %v3451_v37 = vmul.f32 %v5726_v21, %v5726_v21  ;;  %v3452_v2 = vmul.f32 %v5728_v36, %v5728_v36  ;;  %v3453_v30 = vmul.f32 %v5730_v46, %v5730_v46 }
 0x4f3   :  { %v3462_v8 = vsel %vm162_vm0, %v3446_v41, 0.0  ;;  %v3463_v6 = vsel %vm162_vm0, %v3447_v11, 0.0  ;;  %v3465_v26 = vsel %vm162_vm0, %v3448_v57, 0.0  ;;  %v3467_v44 = vsel %vm162_vm0, %v3449_v39, 0.0 }
 0x4f4   :  { %v3464_v1 = vadd.f32 %v3463_v6, %v3462_v8  ;;  %v3469_v18 = vsel %vm162_vm0, %v3450_v16, 0.0  ;;  %v3471_v47 = vsel %vm162_vm0, %v3451_v37, 0.0  ;;  %v3454_v55 = vmul.f32 %v5732_v56, %v5732_v56  ;;  %v3390_v16 = vld [vmem:[%s5891_s7] sm:$0x1] }
 0x4f5   :  { %v3473_v54 = vsel %vm162_vm0, %v3452_v2, 0.0  ;;  %v3455_v60 = vmul.f32 %v5734_v43, %v5734_v43  ;;  %v3475_v5 = vsel %vm162_vm0, %v3453_v30, 0.0  ;;  %v3456_v35 = vmul.f32 %v5736_v12, %v5736_v12  ;;  %v5924_v37 = vld [vmem:[#allocation3_spill] sm:$0xff] }
 0x4f6   :  { %v3466_v24 = vadd.f32 %v3465_v26, %v3464_v1  ;;  %v3477_v13 = vsel %vm162_vm0, %v3454_v55, 0.0  ;;  %v3457_v0 = vmul.f32 %v5738_v33, %v5738_v33  ;;  %v3458_v58 = vmul.f32 %v5740_v63, %v5740_v63 }
 0x4f7   :  { %v3479_v29 = vsel %vm162_vm0, %v3455_v60, 0.0  ;;  %v3481_v25 = vsel %vm162_vm0, %v3456_v35, 0.0  ;;  %v3459_v15 = vmul.f32 %v5742_v14, %v5742_v14  ;;  %v3460_v51 = vmul.f32 %v5744_v38, %v5744_v38 }
 0x4f8   :  { %v3468_v4 = vadd.f32 %v3467_v44, %v3466_v24  ;;  %v3483_v50 = vsel %vm162_vm0, %v3457_v0, 0.0  ;;  %v3485_v45 = vsel %vm162_vm0, %v3458_v58, 0.0  ;;  %v3461_v32 = vmul.f32 %v5746_v62, %v5746_v62 }
 0x4f9   :  { %v3487_v9 = vsel %vm162_vm0, %v3459_v15, 0.0  ;;  %v3489_v7 = vsel %vm162_vm0, %v3460_v51, 0.0  ;;  %v5925_v44 = vsub.s32 0, %v5924_v37 }
 0x4fa   :  { %v3470_v20 = vadd.f32 %v3469_v18, %v3468_v4  ;;  %v3491_v34 = vsel %vm162_vm0, %v3461_v32, 0.0 }
 0x4fc   :  { %v3472_v52 = vadd.f32 %v3471_v47, %v3470_v20  ;;  %v3760_v47 = vld [vmem:[%s5892_s8] ss:$0 sm:$0xff] }
 0x4fe   :  { %v3474_v61 = vadd.f32 %v3473_v54, %v3472_v52 }
 0x500   :  { %v3476_v59 = vadd.f32 %v3475_v5, %v3474_v61 }
 0x502   :  { %v3478_v53 = vadd.f32 %v3477_v13, %v3476_v59 }
 0x504   :  { %v3480_v40 = vadd.f32 %v3479_v29, %v3478_v53 }
 0x506   :  { %v3482_v19 = vadd.f32 %v3481_v25, %v3480_v40 }
 0x508   :  { %v3484_v42 = vadd.f32 %v3483_v50, %v3482_v19 }
 0x50a   :  { %v3486_v10 = vadd.f32 %v3485_v45, %v3484_v42 }
 0x50c   :  { %v3488_v22 = vadd.f32 %v3487_v9, %v3486_v10 }
 0x50e   :  { %v3490_v28 = vadd.f32 %v3489_v7, %v3488_v22 }
 0x510   :  { %v3492_v17 = vadd.f32 %v3491_v34, %v3490_v28 }
 0x512   :  { %v3493_v48 = vrot.slane %v3492_v17, 4 }
 0x514   :  { %v3494_v41 = vadd.f32 %v3493_v48, %v3492_v17 }
 0x516   :  { %v3495_v11 = vrot.slane %v3494_v41, 2 }
 0x518   :  { %v3496_v57 = vadd.f32 %v3495_v11, %v3494_v41 }
 0x51a   :  { %v3497_v39 = vrot.slane %v3496_v57, 1 }
 0x51c   :  { %v3498_v8 = vadd.f32 %v3497_v39, %v3496_v57 }
 0x51e   :  { %v3499_v6 = vmul.f32 0.0078125, %v3498_v8 }
 0x520   :  { %v3500_v1 = vadd.f32 1e-05, %v3499_v6 }
 0x522   :  { %4525 = vrsqrt.f32 %v3500_v1 }
 0x52c   :  { %v4526_v26 = vpop.eup %4525 }
 0x52d   :  { %v3502_v24 = vmul.f32 %v4526_v26, %v3390_v16 }
 0x52f   :  { %v3506_v4 = vrot.slane %v3502_v24, %v5925_v44 }
 0x531   :  { %v3507_v2 = vmul.f32 %v3506_v4, %v5713_v31  ;;  %v3508_v18 = vmul.f32 %v3506_v4, %v5716_v27  ;;  %v3509_v20 = vmul.f32 %v3506_v4, %v5719_v3  ;;  %v3510_v30 = vmul.f32 %v3506_v4, %v5722_v49 }
 0x532   :  { %v3511_v52 = vmul.f32 %v3506_v4, %v5724_v23  ;;  %v3512_v55 = vmul.f32 %v3506_v4, %v5726_v21  ;;  %v3513_v54 = vmul.f32 %v3506_v4, %v5728_v36  ;;  %v3514_v61 = vmul.f32 %v3506_v4, %v5730_v46 }
 0x533   :  { %v3515_v31 = vmul.f32 %v3506_v4, %v5732_v56  ;;  %v3516_v27 = vmul.f32 %v3506_v4, %v5734_v43  ;;  %v3517_v3 = vmul.f32 %v3506_v4, %v5736_v12  ;;  %v3518_v49 = vmul.f32 %v3506_v4, %v5738_v33 }
 0x534   :  { %v3519_v60 = vmul.f32 %v3506_v4, %v5740_v63  ;;  %v3520_v5 = vmul.f32 %v3506_v4, %v5742_v14  ;;  %v3521_v23 = vmul.f32 %v3506_v4, %v5744_v38  ;;  %v3522_v21 = vmul.f32 %v3506_v4, %v5746_v62 }
 0x535   :  { %v3529_v59 = vadd.f32 %v3760_v47, %v3507_v2  ;;  %v3530_v36 = vadd.f32 %v3760_v47, %v3508_v18  ;;  %v3531_v35 = vadd.f32 %v3760_v47, %v3509_v20  ;;  %v3532_v46 = vadd.f32 %v3760_v47, %v3510_v30 }
 0x536   :  { %v3533_v13 = vadd.f32 %v3760_v47, %v3511_v52  ;;  %v3534_v56 = vadd.f32 %v3760_v47, %v3512_v55  ;;  %v3535_v53 = vadd.f32 %v3760_v47, %v3513_v54  ;;  %v3536_v43 = vadd.f32 %v3760_v47, %v3514_v61 }
 0x537   :  { %v3537_v0 = vadd.f32 %v3760_v47, %v3515_v31  ;;  %v3538_v12 = vadd.f32 %v3760_v47, %v3516_v27  ;;  %v3539_v29 = vadd.f32 %v3760_v47, %v3517_v3  ;;  %v3540_v33 = vadd.f32 %v3760_v47, %v3518_v49 }
 0x538   :  { %v3541_v40 = vadd.f32 %v3760_v47, %v3519_v60  ;;  %v3542_v63 = vadd.f32 %v3760_v47, %v3520_v5  ;;  %v3543_v58 = vadd.f32 %v3760_v47, %v3521_v23  ;;  %v3544_v14 = vadd.f32 %v3760_v47, %v3522_v21 }
 0x539   :  { %v3545_v25 = vmax.f32 %v3529_v59, 0.0  ;;  %v3546_v38 = vmax.f32 %v3530_v36, 0.0  ;;  %v3547_v19 = vmax.f32 %v3531_v35, 0.0  ;;  %v3548_v62 = vmax.f32 %v3532_v46, 0.0 }
 0x53a   :  { %v3549_v15 = vmax.f32 %v3533_v13, 0.0  ;;  %v3550_v50 = vmax.f32 %v3534_v56, 0.0  ;;  %v3551_v42 = vmax.f32 %v3535_v53, 0.0  ;;  %v3552_v51 = vmax.f32 %v3536_v43, 0.0 }
 0x53b   :  { %v3553_v45 = vmax.f32 %v3537_v0, 0.0  ;;  %v3554_v10 = vmax.f32 %v3538_v12, 0.0  ;;  %v3555_v32 = vmax.f32 %v3539_v29, 0.0  ;;  %v3556_v9 = vmax.f32 %v3540_v33, 0.0  ;;  %3561 = vst.msk [vmem:[%s5893_s9] sm:$0xff] %vm162_vm0, %v3545_v25  ;;  %3562 = vst.msk [vmem:[%s5893_s9 + $0x8] sm:$0xff] %vm162_vm0, %v3546_v38 }
 0x53c   :  { %3563 = vst.msk [vmem:[%s5893_s9 + $0x10] sm:$0xff] %vm162_vm0, %v3547_v19  ;;  %3564 = vst.msk [vmem:[%s5893_s9 + $0x18] sm:$0xff] %vm162_vm0, %v3548_v62  ;;  %v3557_v22 = vmax.f32 %v3541_v40, 0.0  ;;  %v3558_v7 = vmax.f32 %v3542_v63, 0.0  ;;  %v3559_v28 = vmax.f32 %v3543_v58, 0.0  ;;  %v3560_v34 = vmax.f32 %v3544_v14, 0.0 }
 0x53d   :  { %3565 = vst.msk [vmem:[%s5893_s9 + $0x20] sm:$0xff] %vm162_vm0, %v3549_v15  ;;  %3566 = vst.msk [vmem:[%s5893_s9 + $0x28] sm:$0xff] %vm162_vm0, %v3550_v50 }
 0x53e   :  { %3567 = vst.msk [vmem:[%s5893_s9 + $0x30] sm:$0xff] %vm162_vm0, %v3551_v42  ;;  %3568 = vst.msk [vmem:[%s5893_s9 + $0x38] sm:$0xff] %vm162_vm0, %v3552_v51 }
 0x53f   :  { %3569 = vst.msk [vmem:[%s5893_s9 + $0x40] sm:$0xff] %vm162_vm0, %v3553_v45  ;;  %3570 = vst.msk [vmem:[%s5893_s9 + $0x48] sm:$0xff] %vm162_vm0, %v3554_v10 }
 0x540   :  { %3571 = vst.msk [vmem:[%s5893_s9 + $0x50] sm:$0xff] %vm162_vm0, %v3555_v32  ;;  %3572 = vst.msk [vmem:[%s5893_s9 + $0x58] sm:$0xff] %vm162_vm0, %v3556_v9 }
 0x541   :  { %3573 = vst.msk [vmem:[%s5893_s9 + $0x60] sm:$0xff] %vm162_vm0, %v3557_v22  ;;  %3574 = vst.msk [vmem:[%s5893_s9 + $0x68] sm:$0xff] %vm162_vm0, %v3558_v7 }
 0x542   :  { %3575 = vst.msk [vmem:[%s5893_s9 + $0x70] sm:$0xff] %vm162_vm0, %v3559_v28  ;;  %3576 = vst.msk [vmem:[%s5893_s9 + $0x78] sm:$0xff] %vm162_vm0, %v3560_v34 }

</bundles_post_ra>
